<compile_context>
chip_gen: v6e
topology: v6e:2x2x1
jax: 0.10.0
libtpu: 0.0.40
codegen_flags: <defaults>
</compile_context>

<pallas_src>
import math

import jax
import jax.numpy as jnp
from jax.experimental import pallas as pl
from jax.experimental.pallas import tpu as pltpu

# ------------------------- static configuration ----------------------------
B = 2            # batch
ROBOT_N = 3      # self.robot_n
TASK_N = 5       # self.task_n
N = ROBOT_N + TASK_N
E = 32           # embedding_size
H = 4            # attention_head
D = E // H       # per-head dim
EPS = 1e-5       # BatchNorm1d eps (PyTorch default)

# Packed (E, 10E) weight slab column blocks (all (in, out) layout):
#   [Wq_r/sqrt(D) | Wk_r | Wv_r | Wq_t/sqrt(D) | Wk_t | Wv_t | Wo_r | Wo_t | Wffc1 | Wffc2]
# Packed (9, 6E) bias/BN slab rows:
#   0: fused projection bias [bq_r/sqrt(D)|bk_r|bv_r|bq_t/sqrt(D)|bk_t|bv_t]
#   1: bo_r   2: bo_t   3: b_ffc1   4: b_ffc2
#   5: bn1_gamma   6: bn1_beta   7: bn2_gamma   8: bn2_beta   (rows 1..8 use first E lanes)


# ------------------------------ kernel body ---------------------------------
def _batchnorm(x, gamma, beta):
    """BatchNorm1d training forward, one-pass stats over (B, N) per channel."""
    mean = jnp.mean(x, axis=(0, 1), keepdims=True)
    mean_sq = jnp.mean(x * x, axis=(0, 1), keepdims=True)
    var = mean_sq - mean * mean                       # biased variance
    return (x - mean) * jax.lax.rsqrt(var + EPS) * gamma + beta


def encoder_block_kernel(x_ref, w_ref, b_ref, out_ref, attn_ref):
    x = x_ref[...]                                    # (B, N, E)
    w = w_ref[...]                                    # (E, 10E)
    bias = b_ref[...]                                 # (9, 6E)

    # --- fused Q/K/V projections for BOTH attention blocks (one matmul) ----
    # proj columns: [q_r | k_r | v_r | q_t | k_t | v_t]; 1/sqrt(D) already folded.
    proj = jnp.einsum('bne,ef->bnf', x, w[:, :6 * E],
                      preferred_element_type=jnp.float32) + bias[0:1, :]

    # --- multi-head attention, heads written straight into scratch ---------
    def _head(col_q, col_k, col_v, q_rows, h):
        qh = proj[:, q_rows, col_q * E + h * D: col_q * E + (h + 1) * D]
        kh = proj[:, ROBOT_N:, col_k * E + h * D: col_k * E + (h + 1) * D]
        vh = proj[:, ROBOT_N:, col_v * E + h * D: col_v * E + (h + 1) * D]
        s = jnp.einsum('bqd,bkd->bqk', qh, kh, preferred_element_type=jnp.float32)
        s = s - jnp.max(s, axis=-1, keepdims=True)
        p = jnp.exp(s)
        inv = pl.reciprocal(jnp.sum(p, axis=-1, keepdims=True), approx=True)
        return jnp.einsum('bqk,bkd->bqd', p, vh,
                          preferred_element_type=jnp.float32) * inv

    for h in range(H):                                # static unroll, H = 4
        # robots attend to tasks (Self_Cross_Attention)
        attn_ref[:, :ROBOT_N, h * D:(h + 1) * D] = _head(0, 1, 2, slice(None, ROBOT_N), h)
        # tasks self-attention (Self_Attention)
        attn_ref[:, ROBOT_N:, h * D:(h + 1) * D] = _head(3, 4, 5, slice(ROBOT_N, None), h)

    ao = attn_ref[...]                                # (B, N, E) both branches merged

    # --- both output projections as one matmul + per-row select ------------
    o2 = jnp.einsum('bne,ef->bnf', ao, w[:, 6 * E:8 * E],
                    preferred_element_type=jnp.float32)         # (B, N, 2E)
    is_robot = jax.lax.broadcasted_iota(jnp.int32, (B, N, E), 1) < ROBOT_N
    x_att = jnp.where(is_robot,
                      o2[..., :E] + bias[1:2, :E],              # Wo_r branch
                      o2[..., E:2 * E] + bias[2:3, :E])         # Wo_t branch

    # --- bn1 -> FFN -> residual -> bn2 --------------------------------------
    xb = _batchnorm(x_att, bias[5:6, :E], bias[6:7, :E])        # bn1
    h1 = jnp.einsum('bne,ef->bnf', xb, w[:, 8 * E:9 * E],
                    preferred_element_type=jnp.float32) + bias[3:4, :E]
    h1 = jnp.maximum(h1, 0.0)                                   # ReLU
    h2 = jnp.einsum('bne,ef->bnf', h1, w[:, 9 * E:10 * E],
                    preferred_element_type=jnp.float32) + bias[4:5, :E]
    out_ref[...] = _batchnorm(h2 + xb, bias[7:8, :E], bias[8:9, :E])   # bn2


# ------------------------------- wrapper ------------------------------------
def encoder_block(x, w_slab, b_slab):
    return pl.pallas_call(
        encoder_block_kernel,
        out_shape=jax.ShapeDtypeStruct((B, N, E), jnp.float32),
        in_specs=[pl.BlockSpec(memory_space=pltpu.MemorySpace.VMEM)] * 3,
        out_specs=pl.BlockSpec(memory_space=pltpu.MemorySpace.VMEM),
        scratch_shapes=[pltpu.VMEM((B, N, E), jnp.float32)],
        # No grid: whole problem (<0.1 MiB) fits in one invocation.  On v7x a
        # leading "parallel" grid axis only pays off with many independent
        # batches, which this toy shape does not have.
    )(x, w_slab, b_slab)


# --------------------------- parameter set-up -------------------------------
def init_torch_params(key):
    """PyTorch-layout parameters: Linear weights are (out_features, in_features)."""
    keys = iter(jax.random.split(key, 20))

    def w():
        return jax.random.normal(next(keys), (E, E), jnp.float32) / math.sqrt(E)

    def b():
        return jax.random.normal(next(keys), (E,), jnp.float32) * 0.01

    p = {}
    for name in ('rq', 'rk', 'rv', 'ro',      # robot_attention (cross)
                 'tq', 'tk', 'tv', 'to',      # task_attention (self)
                 'f1', 'f2'):                 # ffc1, ffc2
        p['w_' + name] = w()
        p['b_' + name] = b()
    p['bn1_g'] = jnp.ones((E,), jnp.float32)
    p['bn1_b'] = jnp.zeros((E,), jnp.float32)
    p['bn2_g'] = jnp.ones((E,), jnp.float32)
    p['bn2_b'] = jnp.zeros((E,), jnp.float32)
    return p


def pack_params(p):
    """Host-side packing: pre-transpose to (in, out), fold the 1/sqrt(D) score
    scale into the Q weights/biases, pack everything into two slabs."""
    s = 1.0 / math.sqrt(D)
    w_slab = jnp.concatenate(
        [p['w_rq'].T * s, p['w_rk'].T, p['w_rv'].T,
         p['w_tq'].T * s, p['w_tk'].T, p['w_tv'].T,
         p['w_ro'].T, p['w_to'].T, p['w_f1'].T, p['w_f2'].T], axis=1)   # (E, 10E)

    proj_bias = jnp.concatenate(
        [p['b_rq'] * s, p['b_rk'], p['b_rv'],
         p['b_tq'] * s, p['b_tk'], p['b_tv']])                          # (6E,)

    def row(v):
        return jnp.concatenate([v, jnp.zeros((5 * E,), jnp.float32)])

    b_slab = jnp.stack(
        [proj_bias,
         row(p['b_ro']), row(p['b_to']), row(p['b_f1']), row(p['b_f2']),
         row(p['bn1_g']), row(p['bn1_b']), row(p['bn2_g']), row(p['bn2_b'])],
        axis=0)                                                         # (9, 6E)
    return w_slab, b_slab


if __name__ == "__main__":
    key = jax.random.PRNGKey(0)
    kx, kp = jax.random.split(key)
    x = jax.random.normal(kx, (B, N, E), jnp.float32)
    w_slab, b_slab = pack_params(init_torch_params(kp))

    out = jax.block_until_ready(encoder_block(x, w_slab, b_slab))

    assert out.shape == (B, N, E)
    assert bool(jnp.all(jnp.isfinite(out)))
    print("KERNEL_OK")
</pallas_src>

<mosaic_0001>
module attributes {stable_mosaic.version = 11 : i64} {
  func.func @encoder_block_kernel(%arg0: memref<2x8x32xf32, #tpu.memory_space<vmem>>, %arg1: memref<32x320xf32, #tpu.memory_space<vmem>>, %arg2: memref<9x192xf32, #tpu.memory_space<vmem>>, %arg3: memref<2x8x32xf32, #tpu.memory_space<vmem>>, %arg4: memref<2x8x32xf32, #tpu.memory_space<vmem>>) attributes {dimension_semantics = [], scalar_prefetch = 0 : i64, scratch_operands = 1 : i64, tpu.core_type = #tpu.core_type<tc>} {
    %c0 = arith.constant 0 : index
    %c0_0 = arith.constant 0 : index
    %c0_1 = arith.constant 0 : index
    %0 = vector.load %arg0[%c0, %c0_0, %c0_1] : memref<2x8x32xf32, #tpu.memory_space<vmem>>, vector<2x8x32xf32>
    %c0_2 = arith.constant 0 : index
    %c0_3 = arith.constant 0 : index
    %1 = vector.load %arg1[%c0_2, %c0_3] : memref<32x320xf32, #tpu.memory_space<vmem>>, vector<32x320xf32>
    %c0_4 = arith.constant 0 : index
    %c0_5 = arith.constant 0 : index
    %2 = vector.load %arg2[%c0_4, %c0_5] : memref<9x192xf32, #tpu.memory_space<vmem>>, vector<9x192xf32>
    %3 = vector.extract_strided_slice %1 {offsets = [0, 0], sizes = [32, 192], strides = [1, 1]} : vector<32x320xf32> to vector<32x192xf32>
    "tpu.trace_start"() <{level = 10 : i32, message = "bne,ef->bnf"}> : () -> ()
    %cst = arith.constant dense<0.000000e+00> : vector<2x8x192xf32>
    %4 = tpu.matmul %0, %3, %cst {dimension_numbers = #tpu.dot_dimension_numbers<[2], [0], [0, 1], [1], [0, 0, 0, 1, 1, 1], [], []>} : vector<2x8x32xf32>, vector<32x192xf32>, vector<2x8x192xf32> -> vector<2x8x192xf32>
    "tpu.trace_stop"() : () -> ()
    %5 = vector.extract_strided_slice %2 {offsets = [0, 0], sizes = [1, 192], strides = [1, 1]} : vector<9x192xf32> to vector<1x192xf32>
    %6 = vector.shape_cast %5 : vector<1x192xf32> to vector<1x1x192xf32>
    %7 = vector.broadcast %6 : vector<1x1x192xf32> to vector<2x8x192xf32>
    %8 = arith.addf %4, %7 : vector<2x8x192xf32>
    %9 = vector.extract_strided_slice %8 {offsets = [0, 0, 0], sizes = [2, 3, 8], strides = [1, 1, 1]} : vector<2x8x192xf32> to vector<2x3x8xf32>
    %10 = vector.extract_strided_slice %8 {offsets = [0, 3, 32], sizes = [2, 5, 8], strides = [1, 1, 1]} : vector<2x8x192xf32> to vector<2x5x8xf32>
    %11 = vector.extract_strided_slice %8 {offsets = [0, 3, 64], sizes = [2, 5, 8], strides = [1, 1, 1]} : vector<2x8x192xf32> to vector<2x5x8xf32>
    "tpu.trace_start"() <{level = 10 : i32, message = "bqd,bkd->bqk"}> : () -> ()
    %cst_6 = arith.constant dense<0.000000e+00> : vector<2x3x5xf32>
    %12 = tpu.matmul %9, %10, %cst_6 {dimension_numbers = #tpu.dot_dimension_numbers<[2], [2], [1], [1], [0, 0, 0, 1, 1, 1], [0], [0]>} : vector<2x3x8xf32>, vector<2x5x8xf32>, vector<2x3x5xf32> -> vector<2x3x5xf32>
    "tpu.trace_stop"() : () -> ()
    %cst_7 = arith.constant dense<0xFF800000> : vector<2x3xf32>
    %13 = vector.multi_reduction <maximumf>, %12, %cst_7 [2] : vector<2x3x5xf32> to vector<2x3xf32>
    %14 = vector.shape_cast %13 : vector<2x3xf32> to vector<2x3x1xf32>
    %15 = vector.broadcast %14 : vector<2x3x1xf32> to vector<2x3x5xf32>
    %16 = arith.subf %12, %15 : vector<2x3x5xf32>
    %17 = math.exp %16 : vector<2x3x5xf32>
    %cst_8 = arith.constant dense<0.000000e+00> : vector<2x3xf32>
    %18 = vector.multi_reduction <add>, %17, %cst_8 [2] : vector<2x3x5xf32> to vector<2x3xf32>
    %19 = vector.shape_cast %18 : vector<2x3xf32> to vector<2x3x1xf32>
    %20 = tpu.reciprocal %19 {approx = true} : vector<2x3x1xf32> -> vector<2x3x1xf32>
    "tpu.trace_start"() <{level = 10 : i32, message = "bqk,bkd->bqd"}> : () -> ()
    %cst_9 = arith.constant dense<0.000000e+00> : vector<2x3x8xf32>
    %21 = tpu.matmul %17, %11, %cst_9 {dimension_numbers = #tpu.dot_dimension_numbers<[2], [1], [1], [2], [0, 0, 0, 1, 1, 2], [0], [0]>} : vector<2x3x5xf32>, vector<2x5x8xf32>, vector<2x3x8xf32> -> vector<2x3x8xf32>
    "tpu.trace_stop"() : () -> ()
    %22 = vector.broadcast %20 : vector<2x3x1xf32> to vector<2x3x8xf32>
    %23 = arith.mulf %21, %22 : vector<2x3x8xf32>
    %c0_10 = arith.constant 0 : index
    %c0_11 = arith.constant 0 : index
    %c0_12 = arith.constant 0 : index
    %24 = vector.load %arg4[%c0_10, %c0_11, %c0_12] : memref<2x8x32xf32, #tpu.memory_space<vmem>>, vector<2x3x8xf32>
    tpu.vector_store %arg4[%c0_10, %c0_11, %c0_12], %23 {strides = array<i32>} : memref<2x8x32xf32, #tpu.memory_space<vmem>>, vector<2x3x8xf32>,
    %25 = vector.extract_strided_slice %8 {offsets = [0, 3, 96], sizes = [2, 5, 8], strides = [1, 1, 1]} : vector<2x8x192xf32> to vector<2x5x8xf32>
    %26 = vector.extract_strided_slice %8 {offsets = [0, 3, 128], sizes = [2, 5, 8], strides = [1, 1, 1]} : vector<2x8x192xf32> to vector<2x5x8xf32>
    %27 = vector.extract_strided_slice %8 {offsets = [0, 3, 160], sizes = [2, 5, 8], strides = [1, 1, 1]} : vector<2x8x192xf32> to vector<2x5x8xf32>
    "tpu.trace_start"() <{level = 10 : i32, message = "bqd,bkd->bqk"}> : () -> ()
    %cst_13 = arith.constant dense<0.000000e+00> : vector<2x5x5xf32>
    %28 = tpu.matmul %25, %26, %cst_13 {dimension_numbers = #tpu.dot_dimension_numbers<[2], [2], [1], [1], [0, 0, 0, 1, 1, 1], [0], [0]>} : vector<2x5x8xf32>, vector<2x5x8xf32>, vector<2x5x5xf32> -> vector<2x5x5xf32>
    "tpu.trace_stop"() : () -> ()
    %cst_14 = arith.constant dense<0xFF800000> : vector<2x5xf32>
    %29 = vector.multi_reduction <maximumf>, %28, %cst_14 [2] : vector<2x5x5xf32> to vector<2x5xf32>
    %30 = vector.shape_cast %29 : vector<2x5xf32> to vector<2x5x1xf32>
    %31 = vector.broadcast %30 : vector<2x5x1xf32> to vector<2x5x5xf32>
    %32 = arith.subf %28, %31 : vector<2x5x5xf32>
    %33 = math.exp %32 : vector<2x5x5xf32>
    %cst_15 = arith.constant dense<0.000000e+00> : vector<2x5xf32>
    %34 = vector.multi_reduction <add>, %33, %cst_15 [2] : vector<2x5x5xf32> to vector<2x5xf32>
    %35 = vector.shape_cast %34 : vector<2x5xf32> to vector<2x5x1xf32>
    %36 = tpu.reciprocal %35 {approx = true} : vector<2x5x1xf32> -> vector<2x5x1xf32>
    "tpu.trace_start"() <{level = 10 : i32, message = "bqk,bkd->bqd"}> : () -> ()
    %cst_16 = arith.constant dense<0.000000e+00> : vector<2x5x8xf32>
    %37 = tpu.matmul %33, %27, %cst_16 {dimension_numbers = #tpu.dot_dimension_numbers<[2], [1], [1], [2], [0, 0, 0, 1, 1, 2], [0], [0]>} : vector<2x5x5xf32>, vector<2x5x8xf32>, vector<2x5x8xf32> -> vector<2x5x8xf32>
    "tpu.trace_stop"() : () -> ()
    %38 = vector.broadcast %36 : vector<2x5x1xf32> to vector<2x5x8xf32>
    %39 = arith.mulf %37, %38 : vector<2x5x8xf32>
    %c0_17 = arith.constant 0 : index
    %c3 = arith.constant 3 : index
    %c0_18 = arith.constant 0 : index
    %40 = vector.load %arg4[%c0_17, %c3, %c0_18] : memref<2x8x32xf32, #tpu.memory_space<vmem>>, vector<2x5x8xf32>
    tpu.vector_store %arg4[%c0_17, %c3, %c0_18], %39 {strides = array<i32>} : memref<2x8x32xf32, #tpu.memory_space<vmem>>, vector<2x5x8xf32>,
    %41 = vector.extract_strided_slice %8 {offsets = [0, 0, 8], sizes = [2, 3, 8], strides = [1, 1, 1]} : vector<2x8x192xf32> to vector<2x3x8xf32>
    %42 = vector.extract_strided_slice %8 {offsets = [0, 3, 40], sizes = [2, 5, 8], strides = [1, 1, 1]} : vector<2x8x192xf32> to vector<2x5x8xf32>
    %43 = vector.extract_strided_slice %8 {offsets = [0, 3, 72], sizes = [2, 5, 8], strides = [1, 1, 1]} : vector<2x8x192xf32> to vector<2x5x8xf32>
    "tpu.trace_start"() <{level = 10 : i32, message = "bqd,bkd->bqk"}> : () -> ()
    %cst_19 = arith.constant dense<0.000000e+00> : vector<2x3x5xf32>
    %44 = tpu.matmul %41, %42, %cst_19 {dimension_numbers = #tpu.dot_dimension_numbers<[2], [2], [1], [1], [0, 0, 0, 1, 1, 1], [0], [0]>} : vector<2x3x8xf32>, vector<2x5x8xf32>, vector<2x3x5xf32> -> vector<2x3x5xf32>
    "tpu.trace_stop"() : () -> ()
    %cst_20 = arith.constant dense<0xFF800000> : vector<2x3xf32>
    %45 = vector.multi_reduction <maximumf>, %44, %cst_20 [2] : vector<2x3x5xf32> to vector<2x3xf32>
    %46 = vector.shape_cast %45 : vector<2x3xf32> to vector<2x3x1xf32>
    %47 = vector.broadcast %46 : vector<2x3x1xf32> to vector<2x3x5xf32>
    %48 = arith.subf %44, %47 : vector<2x3x5xf32>
    %49 = math.exp %48 : vector<2x3x5xf32>
    %cst_21 = arith.constant dense<0.000000e+00> : vector<2x3xf32>
    %50 = vector.multi_reduction <add>, %49, %cst_21 [2] : vector<2x3x5xf32> to vector<2x3xf32>
    %51 = vector.shape_cast %50 : vector<2x3xf32> to vector<2x3x1xf32>
    %52 = tpu.reciprocal %51 {approx = true} : vector<2x3x1xf32> -> vector<2x3x1xf32>
    "tpu.trace_start"() <{level = 10 : i32, message = "bqk,bkd->bqd"}> : () -> ()
    %cst_22 = arith.constant dense<0.000000e+00> : vector<2x3x8xf32>
    %53 = tpu.matmul %49, %43, %cst_22 {dimension_numbers = #tpu.dot_dimension_numbers<[2], [1], [1], [2], [0, 0, 0, 1, 1, 2], [0], [0]>} : vector<2x3x5xf32>, vector<2x5x8xf32>, vector<2x3x8xf32> -> vector<2x3x8xf32>
    "tpu.trace_stop"() : () -> ()
    %54 = vector.broadcast %52 : vector<2x3x1xf32> to vector<2x3x8xf32>
    %55 = arith.mulf %53, %54 : vector<2x3x8xf32>
    %c0_23 = arith.constant 0 : index
    %c0_24 = arith.constant 0 : index
    %c8 = arith.constant 8 : index
    %56 = vector.load %arg4[%c0_23, %c0_24, %c8] : memref<2x8x32xf32, #tpu.memory_space<vmem>>, vector<2x3x8xf32>
    tpu.vector_store %arg4[%c0_23, %c0_24, %c8], %55 {strides = array<i32>} : memref<2x8x32xf32, #tpu.memory_space<vmem>>, vector<2x3x8xf32>,
    %57 = vector.extract_strided_slice %8 {offsets = [0, 3, 104], sizes = [2, 5, 8], strides = [1, 1, 1]} : vector<2x8x192xf32> to vector<2x5x8xf32>
    %58 = vector.extract_strided_slice %8 {offsets = [0, 3, 136], sizes = [2, 5, 8], strides = [1, 1, 1]} : vector<2x8x192xf32> to vector<2x5x8xf32>
    %59 = vector.extract_strided_slice %8 {offsets = [0, 3, 168], sizes = [2, 5, 8], strides = [1, 1, 1]} : vector<2x8x192xf32> to vector<2x5x8xf32>
    "tpu.trace_start"() <{level = 10 : i32, message = "bqd,bkd->bqk"}> : () -> ()
    %cst_25 = arith.constant dense<0.000000e+00> : vector<2x5x5xf32>
    %60 = tpu.matmul %57, %58, %cst_25 {dimension_numbers = #tpu.dot_dimension_numbers<[2], [2], [1], [1], [0, 0, 0, 1, 1, 1], [0], [0]>} : vector<2x5x8xf32>, vector<2x5x8xf32>, vector<2x5x5xf32> -> vector<2x5x5xf32>
    "tpu.trace_stop"() : () -> ()
    %cst_26 = arith.constant dense<0xFF800000> : vector<2x5xf32>
    %61 = vector.multi_reduction <maximumf>, %60, %cst_26 [2] : vector<2x5x5xf32> to vector<2x5xf32>
    %62 = vector.shape_cast %61 : vector<2x5xf32> to vector<2x5x1xf32>
    %63 = vector.broadcast %62 : vector<2x5x1xf32> to vector<2x5x5xf32>
    %64 = arith.subf %60, %63 : vector<2x5x5xf32>
    %65 = math.exp %64 : vector<2x5x5xf32>
    %cst_27 = arith.constant dense<0.000000e+00> : vector<2x5xf32>
    %66 = vector.multi_reduction <add>, %65, %cst_27 [2] : vector<2x5x5xf32> to vector<2x5xf32>
    %67 = vector.shape_cast %66 : vector<2x5xf32> to vector<2x5x1xf32>
    %68 = tpu.reciprocal %67 {approx = true} : vector<2x5x1xf32> -> vector<2x5x1xf32>
    "tpu.trace_start"() <{level = 10 : i32, message = "bqk,bkd->bqd"}> : () -> ()
    %cst_28 = arith.constant dense<0.000000e+00> : vector<2x5x8xf32>
    %69 = tpu.matmul %65, %59, %cst_28 {dimension_numbers = #tpu.dot_dimension_numbers<[2], [1], [1], [2], [0, 0, 0, 1, 1, 2], [0], [0]>} : vector<2x5x5xf32>, vector<2x5x8xf32>, vector<2x5x8xf32> -> vector<2x5x8xf32>
    "tpu.trace_stop"() : () -> ()
    %70 = vector.broadcast %68 : vector<2x5x1xf32> to vector<2x5x8xf32>
    %71 = arith.mulf %69, %70 : vector<2x5x8xf32>
    %c0_29 = arith.constant 0 : index
    %c3_30 = arith.constant 3 : index
    %c8_31 = arith.constant 8 : index
    %72 = vector.load %arg4[%c0_29, %c3_30, %c8_31] : memref<2x8x32xf32, #tpu.memory_space<vmem>>, vector<2x5x8xf32>
    tpu.vector_store %arg4[%c0_29, %c3_30, %c8_31], %71 {strides = array<i32>} : memref<2x8x32xf32, #tpu.memory_space<vmem>>, vector<2x5x8xf32>,
    %73 = vector.extract_strided_slice %8 {offsets = [0, 0, 16], sizes = [2, 3, 8], strides = [1, 1, 1]} : vector<2x8x192xf32> to vector<2x3x8xf32>
    %74 = vector.extract_strided_slice %8 {offsets = [0, 3, 48], sizes = [2, 5, 8], strides = [1, 1, 1]} : vector<2x8x192xf32> to vector<2x5x8xf32>
    %75 = vector.extract_strided_slice %8 {offsets = [0, 3, 80], sizes = [2, 5, 8], strides = [1, 1, 1]} : vector<2x8x192xf32> to vector<2x5x8xf32>
    "tpu.trace_start"() <{level = 10 : i32, message = "bqd,bkd->bqk"}> : () -> ()
    %cst_32 = arith.constant dense<0.000000e+00> : vector<2x3x5xf32>
    %76 = tpu.matmul %73, %74, %cst_32 {dimension_numbers = #tpu.dot_dimension_numbers<[2], [2], [1], [1], [0, 0, 0, 1, 1, 1], [0], [0]>} : vector<2x3x8xf32>, vector<2x5x8xf32>, vector<2x3x5xf32> -> vector<2x3x5xf32>
    "tpu.trace_stop"() : () -> ()
    %cst_33 = arith.constant dense<0xFF800000> : vector<2x3xf32>
    %77 = vector.multi_reduction <maximumf>, %76, %cst_33 [2] : vector<2x3x5xf32> to vector<2x3xf32>
    %78 = vector.shape_cast %77 : vector<2x3xf32> to vector<2x3x1xf32>
    %79 = vector.broadcast %78 : vector<2x3x1xf32> to vector<2x3x5xf32>
    %80 = arith.subf %76, %79 : vector<2x3x5xf32>
    %81 = math.exp %80 : vector<2x3x5xf32>
    %cst_34 = arith.constant dense<0.000000e+00> : vector<2x3xf32>
    %82 = vector.multi_reduction <add>, %81, %cst_34 [2] : vector<2x3x5xf32> to vector<2x3xf32>
    %83 = vector.shape_cast %82 : vector<2x3xf32> to vector<2x3x1xf32>
    %84 = tpu.reciprocal %83 {approx = true} : vector<2x3x1xf32> -> vector<2x3x1xf32>
    "tpu.trace_start"() <{level = 10 : i32, message = "bqk,bkd->bqd"}> : () -> ()
    %cst_35 = arith.constant dense<0.000000e+00> : vector<2x3x8xf32>
    %85 = tpu.matmul %81, %75, %cst_35 {dimension_numbers = #tpu.dot_dimension_numbers<[2], [1], [1], [2], [0, 0, 0, 1, 1, 2], [0], [0]>} : vector<2x3x5xf32>, vector<2x5x8xf32>, vector<2x3x8xf32> -> vector<2x3x8xf32>
    "tpu.trace_stop"() : () -> ()
    %86 = vector.broadcast %84 : vector<2x3x1xf32> to vector<2x3x8xf32>
    %87 = arith.mulf %85, %86 : vector<2x3x8xf32>
    %c0_36 = arith.constant 0 : index
    %c0_37 = arith.constant 0 : index
    %c16 = arith.constant 16 : index
    %88 = vector.load %arg4[%c0_36, %c0_37, %c16] : memref<2x8x32xf32, #tpu.memory_space<vmem>>, vector<2x3x8xf32>
    tpu.vector_store %arg4[%c0_36, %c0_37, %c16], %87 {strides = array<i32>} : memref<2x8x32xf32, #tpu.memory_space<vmem>>, vector<2x3x8xf32>,
    %89 = vector.extract_strided_slice %8 {offsets = [0, 3, 112], sizes = [2, 5, 8], strides = [1, 1, 1]} : vector<2x8x192xf32> to vector<2x5x8xf32>
    %90 = vector.extract_strided_slice %8 {offsets = [0, 3, 144], sizes = [2, 5, 8], strides = [1, 1, 1]} : vector<2x8x192xf32> to vector<2x5x8xf32>
    %91 = vector.extract_strided_slice %8 {offsets = [0, 3, 176], sizes = [2, 5, 8], strides = [1, 1, 1]} : vector<2x8x192xf32> to vector<2x5x8xf32>
    "tpu.trace_start"() <{level = 10 : i32, message = "bqd,bkd->bqk"}> : () -> ()
    %cst_38 = arith.constant dense<0.000000e+00> : vector<2x5x5xf32>
    %92 = tpu.matmul %89, %90, %cst_38 {dimension_numbers = #tpu.dot_dimension_numbers<[2], [2], [1], [1], [0, 0, 0, 1, 1, 1], [0], [0]>} : vector<2x5x8xf32>, vector<2x5x8xf32>, vector<2x5x5xf32> -> vector<2x5x5xf32>
    "tpu.trace_stop"() : () -> ()
    %cst_39 = arith.constant dense<0xFF800000> : vector<2x5xf32>
    %93 = vector.multi_reduction <maximumf>, %92, %cst_39 [2] : vector<2x5x5xf32> to vector<2x5xf32>
    %94 = vector.shape_cast %93 : vector<2x5xf32> to vector<2x5x1xf32>
    %95 = vector.broadcast %94 : vector<2x5x1xf32> to vector<2x5x5xf32>
    %96 = arith.subf %92, %95 : vector<2x5x5xf32>
    %97 = math.exp %96 : vector<2x5x5xf32>
    %cst_40 = arith.constant dense<0.000000e+00> : vector<2x5xf32>
    %98 = vector.multi_reduction <add>, %97, %cst_40 [2] : vector<2x5x5xf32> to vector<2x5xf32>
    %99 = vector.shape_cast %98 : vector<2x5xf32> to vector<2x5x1xf32>
    %100 = tpu.reciprocal %99 {approx = true} : vector<2x5x1xf32> -> vector<2x5x1xf32>
    "tpu.trace_start"() <{level = 10 : i32, message = "bqk,bkd->bqd"}> : () -> ()
    %cst_41 = arith.constant dense<0.000000e+00> : vector<2x5x8xf32>
    %101 = tpu.matmul %97, %91, %cst_41 {dimension_numbers = #tpu.dot_dimension_numbers<[2], [1], [1], [2], [0, 0, 0, 1, 1, 2], [0], [0]>} : vector<2x5x5xf32>, vector<2x5x8xf32>, vector<2x5x8xf32> -> vector<2x5x8xf32>
    "tpu.trace_stop"() : () -> ()
    %102 = vector.broadcast %100 : vector<2x5x1xf32> to vector<2x5x8xf32>
    %103 = arith.mulf %101, %102 : vector<2x5x8xf32>
    %c0_42 = arith.constant 0 : index
    %c3_43 = arith.constant 3 : index
    %c16_44 = arith.constant 16 : index
    %104 = vector.load %arg4[%c0_42, %c3_43, %c16_44] : memref<2x8x32xf32, #tpu.memory_space<vmem>>, vector<2x5x8xf32>
    tpu.vector_store %arg4[%c0_42, %c3_43, %c16_44], %103 {strides = array<i32>} : memref<2x8x32xf32, #tpu.memory_space<vmem>>, vector<2x5x8xf32>,
    %105 = vector.extract_strided_slice %8 {offsets = [0, 0, 24], sizes = [2, 3, 8], strides = [1, 1, 1]} : vector<2x8x192xf32> to vector<2x3x8xf32>
    %106 = vector.extract_strided_slice %8 {offsets = [0, 3, 56], sizes = [2, 5, 8], strides = [1, 1, 1]} : vector<2x8x192xf32> to vector<2x5x8xf32>
    %107 = vector.extract_strided_slice %8 {offsets = [0, 3, 88], sizes = [2, 5, 8], strides = [1, 1, 1]} : vector<2x8x192xf32> to vector<2x5x8xf32>
    "tpu.trace_start"() <{level = 10 : i32, message = "bqd,bkd->bqk"}> : () -> ()
    %cst_45 = arith.constant dense<0.000000e+00> : vector<2x3x5xf32>
    %108 = tpu.matmul %105, %106, %cst_45 {dimension_numbers = #tpu.dot_dimension_numbers<[2], [2], [1], [1], [0, 0, 0, 1, 1, 1], [0], [0]>} : vector<2x3x8xf32>, vector<2x5x8xf32>, vector<2x3x5xf32> -> vector<2x3x5xf32>
    "tpu.trace_stop"() : () -> ()
    %cst_46 = arith.constant dense<0xFF800000> : vector<2x3xf32>
    %109 = vector.multi_reduction <maximumf>, %108, %cst_46 [2] : vector<2x3x5xf32> to vector<2x3xf32>
    %110 = vector.shape_cast %109 : vector<2x3xf32> to vector<2x3x1xf32>
    %111 = vector.broadcast %110 : vector<2x3x1xf32> to vector<2x3x5xf32>
    %112 = arith.subf %108, %111 : vector<2x3x5xf32>
    %113 = math.exp %112 : vector<2x3x5xf32>
    %cst_47 = arith.constant dense<0.000000e+00> : vector<2x3xf32>
    %114 = vector.multi_reduction <add>, %113, %cst_47 [2] : vector<2x3x5xf32> to vector<2x3xf32>
    %115 = vector.shape_cast %114 : vector<2x3xf32> to vector<2x3x1xf32>
    %116 = tpu.reciprocal %115 {approx = true} : vector<2x3x1xf32> -> vector<2x3x1xf32>
    "tpu.trace_start"() <{level = 10 : i32, message = "bqk,bkd->bqd"}> : () -> ()
    %cst_48 = arith.constant dense<0.000000e+00> : vector<2x3x8xf32>
    %117 = tpu.matmul %113, %107, %cst_48 {dimension_numbers = #tpu.dot_dimension_numbers<[2], [1], [1], [2], [0, 0, 0, 1, 1, 2], [0], [0]>} : vector<2x3x5xf32>, vector<2x5x8xf32>, vector<2x3x8xf32> -> vector<2x3x8xf32>
    "tpu.trace_stop"() : () -> ()
    %118 = vector.broadcast %116 : vector<2x3x1xf32> to vector<2x3x8xf32>
    %119 = arith.mulf %117, %118 : vector<2x3x8xf32>
    %c0_49 = arith.constant 0 : index
    %c0_50 = arith.constant 0 : index
    %c24 = arith.constant 24 : index
    %120 = vector.load %arg4[%c0_49, %c0_50, %c24] : memref<2x8x32xf32, #tpu.memory_space<vmem>>, vector<2x3x8xf32>
    tpu.vector_store %arg4[%c0_49, %c0_50, %c24], %119 {strides = array<i32>} : memref<2x8x32xf32, #tpu.memory_space<vmem>>, vector<2x3x8xf32>,
    %121 = vector.extract_strided_slice %8 {offsets = [0, 3, 120], sizes = [2, 5, 8], strides = [1, 1, 1]} : vector<2x8x192xf32> to vector<2x5x8xf32>
    %122 = vector.extract_strided_slice %8 {offsets = [0, 3, 152], sizes = [2, 5, 8], strides = [1, 1, 1]} : vector<2x8x192xf32> to vector<2x5x8xf32>
    %123 = vector.extract_strided_slice %8 {offsets = [0, 3, 184], sizes = [2, 5, 8], strides = [1, 1, 1]} : vector<2x8x192xf32> to vector<2x5x8xf32>
    "tpu.trace_start"() <{level = 10 : i32, message = "bqd,bkd->bqk"}> : () -> ()
    %cst_51 = arith.constant dense<0.000000e+00> : vector<2x5x5xf32>
    %124 = tpu.matmul %121, %122, %cst_51 {dimension_numbers = #tpu.dot_dimension_numbers<[2], [2], [1], [1], [0, 0, 0, 1, 1, 1], [0], [0]>} : vector<2x5x8xf32>, vector<2x5x8xf32>, vector<2x5x5xf32> -> vector<2x5x5xf32>
    "tpu.trace_stop"() : () -> ()
    %cst_52 = arith.constant dense<0xFF800000> : vector<2x5xf32>
    %125 = vector.multi_reduction <maximumf>, %124, %cst_52 [2] : vector<2x5x5xf32> to vector<2x5xf32>
    %126 = vector.shape_cast %125 : vector<2x5xf32> to vector<2x5x1xf32>
    %127 = vector.broadcast %126 : vector<2x5x1xf32> to vector<2x5x5xf32>
    %128 = arith.subf %124, %127 : vector<2x5x5xf32>
    %129 = math.exp %128 : vector<2x5x5xf32>
    %cst_53 = arith.constant dense<0.000000e+00> : vector<2x5xf32>
    %130 = vector.multi_reduction <add>, %129, %cst_53 [2] : vector<2x5x5xf32> to vector<2x5xf32>
    %131 = vector.shape_cast %130 : vector<2x5xf32> to vector<2x5x1xf32>
    %132 = tpu.reciprocal %131 {approx = true} : vector<2x5x1xf32> -> vector<2x5x1xf32>
    "tpu.trace_start"() <{level = 10 : i32, message = "bqk,bkd->bqd"}> : () -> ()
    %cst_54 = arith.constant dense<0.000000e+00> : vector<2x5x8xf32>
    %133 = tpu.matmul %129, %123, %cst_54 {dimension_numbers = #tpu.dot_dimension_numbers<[2], [1], [1], [2], [0, 0, 0, 1, 1, 2], [0], [0]>} : vector<2x5x5xf32>, vector<2x5x8xf32>, vector<2x5x8xf32> -> vector<2x5x8xf32>
    "tpu.trace_stop"() : () -> ()
    %134 = vector.broadcast %132 : vector<2x5x1xf32> to vector<2x5x8xf32>
    %135 = arith.mulf %133, %134 : vector<2x5x8xf32>
    %c0_55 = arith.constant 0 : index
    %c3_56 = arith.constant 3 : index
    %c24_57 = arith.constant 24 : index
    %136 = vector.load %arg4[%c0_55, %c3_56, %c24_57] : memref<2x8x32xf32, #tpu.memory_space<vmem>>, vector<2x5x8xf32>
    tpu.vector_store %arg4[%c0_55, %c3_56, %c24_57], %135 {strides = array<i32>} : memref<2x8x32xf32, #tpu.memory_space<vmem>>, vector<2x5x8xf32>,
    %c0_58 = arith.constant 0 : index
    %c0_59 = arith.constant 0 : index
    %c0_60 = arith.constant 0 : index
    %137 = vector.load %arg4[%c0_58, %c0_59, %c0_60] : memref<2x8x32xf32, #tpu.memory_space<vmem>>, vector<2x8x32xf32>
    %138 = vector.extract_strided_slice %1 {offsets = [0, 192], sizes = [32, 64], strides = [1, 1]} : vector<32x320xf32> to vector<32x64xf32>
    "tpu.trace_start"() <{level = 10 : i32, message = "bne,ef->bnf"}> : () -> ()
    %cst_61 = arith.constant dense<0.000000e+00> : vector<2x8x64xf32>
    %139 = tpu.matmul %137, %138, %cst_61 {dimension_numbers = #tpu.dot_dimension_numbers<[2], [0], [0, 1], [1], [0, 0, 0, 1, 1, 1], [], []>} : vector<2x8x32xf32>, vector<32x64xf32>, vector<2x8x64xf32> -> vector<2x8x64xf32>
    "tpu.trace_stop"() : () -> ()
    %140 = tpu.iota {dimensions = array<i32: 1>} : vector<2x8x32xi32>
    %c3_i32 = arith.constant 3 : i32
    %141 = vector.broadcast %c3_i32 : i32 to vector<2x8x32xi32>
    %142 = arith.cmpi slt, %140, %141 : vector<2x8x32xi32>
    %143 = vector.extract_strided_slice %139 {offsets = [0, 0, 0], sizes = [2, 8, 32], strides = [1, 1, 1]} : vector<2x8x64xf32> to vector<2x8x32xf32>
    %144 = vector.extract_strided_slice %2 {offsets = [1, 0], sizes = [1, 32], strides = [1, 1]} : vector<9x192xf32> to vector<1x32xf32>
    %145 = vector.shape_cast %144 : vector<1x32xf32> to vector<1x1x32xf32>
    %146 = vector.broadcast %145 : vector<1x1x32xf32> to vector<2x8x32xf32>
    %147 = arith.addf %143, %146 : vector<2x8x32xf32>
    %148 = vector.extract_strided_slice %139 {offsets = [0, 0, 32], sizes = [2, 8, 32], strides = [1, 1, 1]} : vector<2x8x64xf32> to vector<2x8x32xf32>
    %149 = vector.extract_strided_slice %2 {offsets = [2, 0], sizes = [1, 32], strides = [1, 1]} : vector<9x192xf32> to vector<1x32xf32>
    %150 = vector.shape_cast %149 : vector<1x32xf32> to vector<1x1x32xf32>
    %151 = vector.broadcast %150 : vector<1x1x32xf32> to vector<2x8x32xf32>
    %152 = arith.addf %148, %151 : vector<2x8x32xf32>
    %153 = arith.select %142, %147, %152 : vector<2x8x32xi1>, vector<2x8x32xf32>
    %154 = vector.extract_strided_slice %2 {offsets = [5, 0], sizes = [1, 32], strides = [1, 1]} : vector<9x192xf32> to vector<1x32xf32>
    %155 = vector.extract_strided_slice %2 {offsets = [6, 0], sizes = [1, 32], strides = [1, 1]} : vector<9x192xf32> to vector<1x32xf32>
    %cst_62 = arith.constant dense<0.000000e+00> : vector<32xf32>
    %156 = vector.multi_reduction <add>, %153, %cst_62 [0, 1] : vector<2x8x32xf32> to vector<32xf32>
    %157 = vector.shape_cast %156 : vector<32xf32> to vector<1x1x32xf32>
    %cst_63 = arith.constant 1.600000e+01 : f32
    %158 = vector.broadcast %cst_63 : f32 to vector<1x1x32xf32>
    %159 = arith.divf %157, %158 : vector<1x1x32xf32>
    %160 = arith.mulf %153, %153 : vector<2x8x32xf32>
    %cst_64 = arith.constant dense<0.000000e+00> : vector<32xf32>
    %161 = vector.multi_reduction <add>, %160, %cst_64 [0, 1] : vector<2x8x32xf32> to vector<32xf32>
    %162 = vector.shape_cast %161 : vector<32xf32> to vector<1x1x32xf32>
    %cst_65 = arith.constant 1.600000e+01 : f32
    %163 = vector.broadcast %cst_65 : f32 to vector<1x1x32xf32>
    %164 = arith.divf %162, %163 : vector<1x1x32xf32>
    %165 = arith.mulf %159, %159 : vector<1x1x32xf32>
    %166 = arith.subf %164, %165 : vector<1x1x32xf32>
    %167 = vector.broadcast %159 : vector<1x1x32xf32> to vector<2x8x32xf32>
    %168 = arith.subf %153, %167 : vector<2x8x32xf32>
    %cst_66 = arith.constant 9.99999974E-6 : f32
    %169 = vector.broadcast %cst_66 : f32 to vector<1x1x32xf32>
    %170 = arith.addf %166, %169 : vector<1x1x32xf32>
    %171 = math.rsqrt %170 : vector<1x1x32xf32>
    %172 = vector.broadcast %171 : vector<1x1x32xf32> to vector<2x8x32xf32>
    %173 = arith.mulf %168, %172 : vector<2x8x32xf32>
    %174 = vector.shape_cast %154 : vector<1x32xf32> to vector<1x1x32xf32>
    %175 = vector.broadcast %174 : vector<1x1x32xf32> to vector<2x8x32xf32>
    %176 = arith.mulf %173, %175 : vector<2x8x32xf32>
    %177 = vector.shape_cast %155 : vector<1x32xf32> to vector<1x1x32xf32>
    %178 = vector.broadcast %177 : vector<1x1x32xf32> to vector<2x8x32xf32>
    %179 = arith.addf %176, %178 : vector<2x8x32xf32>
    %180 = vector.extract_strided_slice %1 {offsets = [0, 256], sizes = [32, 32], strides = [1, 1]} : vector<32x320xf32> to vector<32x32xf32>
    "tpu.trace_start"() <{level = 10 : i32, message = "bne,ef->bnf"}> : () -> ()
    %cst_67 = arith.constant dense<0.000000e+00> : vector<2x8x32xf32>
    %181 = tpu.matmul %179, %180, %cst_67 {dimension_numbers = #tpu.dot_dimension_numbers<[2], [0], [0, 1], [1], [0, 0, 0, 1, 1, 1], [], []>} : vector<2x8x32xf32>, vector<32x32xf32>, vector<2x8x32xf32> -> vector<2x8x32xf32>
    "tpu.trace_stop"() : () -> ()
    %182 = vector.extract_strided_slice %2 {offsets = [3, 0], sizes = [1, 32], strides = [1, 1]} : vector<9x192xf32> to vector<1x32xf32>
    %183 = vector.shape_cast %182 : vector<1x32xf32> to vector<1x1x32xf32>
    %184 = vector.broadcast %183 : vector<1x1x32xf32> to vector<2x8x32xf32>
    %185 = arith.addf %181, %184 : vector<2x8x32xf32>
    %cst_68 = arith.constant 0.000000e+00 : f32
    %186 = vector.broadcast %cst_68 : f32 to vector<2x8x32xf32>
    %187 = arith.maximumf %185, %186 : vector<2x8x32xf32>
    %188 = vector.extract_strided_slice %1 {offsets = [0, 288], sizes = [32, 32], strides = [1, 1]} : vector<32x320xf32> to vector<32x32xf32>
    "tpu.trace_start"() <{level = 10 : i32, message = "bne,ef->bnf"}> : () -> ()
    %cst_69 = arith.constant dense<0.000000e+00> : vector<2x8x32xf32>
    %189 = tpu.matmul %187, %188, %cst_69 {dimension_numbers = #tpu.dot_dimension_numbers<[2], [0], [0, 1], [1], [0, 0, 0, 1, 1, 1], [], []>} : vector<2x8x32xf32>, vector<32x32xf32>, vector<2x8x32xf32> -> vector<2x8x32xf32>
    "tpu.trace_stop"() : () -> ()
    %190 = vector.extract_strided_slice %2 {offsets = [4, 0], sizes = [1, 32], strides = [1, 1]} : vector<9x192xf32> to vector<1x32xf32>
    %191 = vector.shape_cast %190 : vector<1x32xf32> to vector<1x1x32xf32>
    %192 = vector.broadcast %191 : vector<1x1x32xf32> to vector<2x8x32xf32>
    %193 = arith.addf %189, %192 : vector<2x8x32xf32>
    %194 = arith.addf %193, %179 : vector<2x8x32xf32>
    %195 = vector.extract_strided_slice %2 {offsets = [7, 0], sizes = [1, 32], strides = [1, 1]} : vector<9x192xf32> to vector<1x32xf32>
    %196 = vector.extract_strided_slice %2 {offsets = [8, 0], sizes = [1, 32], strides = [1, 1]} : vector<9x192xf32> to vector<1x32xf32>
    %cst_70 = arith.constant dense<0.000000e+00> : vector<32xf32>
    %197 = vector.multi_reduction <add>, %194, %cst_70 [0, 1] : vector<2x8x32xf32> to vector<32xf32>
    %198 = vector.shape_cast %197 : vector<32xf32> to vector<1x1x32xf32>
    %cst_71 = arith.constant 1.600000e+01 : f32
    %199 = vector.broadcast %cst_71 : f32 to vector<1x1x32xf32>
    %200 = arith.divf %198, %199 : vector<1x1x32xf32>
    %201 = arith.mulf %194, %194 : vector<2x8x32xf32>
    %cst_72 = arith.constant dense<0.000000e+00> : vector<32xf32>
    %202 = vector.multi_reduction <add>, %201, %cst_72 [0, 1] : vector<2x8x32xf32> to vector<32xf32>
    %203 = vector.shape_cast %202 : vector<32xf32> to vector<1x1x32xf32>
    %cst_73 = arith.constant 1.600000e+01 : f32
    %204 = vector.broadcast %cst_73 : f32 to vector<1x1x32xf32>
    %205 = arith.divf %203, %204 : vector<1x1x32xf32>
    %206 = arith.mulf %200, %200 : vector<1x1x32xf32>
    %207 = arith.subf %205, %206 : vector<1x1x32xf32>
    %208 = vector.broadcast %200 : vector<1x1x32xf32> to vector<2x8x32xf32>
    %209 = arith.subf %194, %208 : vector<2x8x32xf32>
    %cst_74 = arith.constant 9.99999974E-6 : f32
    %210 = vector.broadcast %cst_74 : f32 to vector<1x1x32xf32>
    %211 = arith.addf %207, %210 : vector<1x1x32xf32>
    %212 = math.rsqrt %211 : vector<1x1x32xf32>
    %213 = vector.broadcast %212 : vector<1x1x32xf32> to vector<2x8x32xf32>
    %214 = arith.mulf %209, %213 : vector<2x8x32xf32>
    %215 = vector.shape_cast %195 : vector<1x32xf32> to vector<1x1x32xf32>
    %216 = vector.broadcast %215 : vector<1x1x32xf32> to vector<2x8x32xf32>
    %217 = arith.mulf %214, %216 : vector<2x8x32xf32>
    %218 = vector.shape_cast %196 : vector<1x32xf32> to vector<1x1x32xf32>
    %219 = vector.broadcast %218 : vector<1x1x32xf32> to vector<2x8x32xf32>
    %220 = arith.addf %217, %219 : vector<2x8x32xf32>
    %c0_75 = arith.constant 0 : index
    %c0_76 = arith.constant 0 : index
    %c0_77 = arith.constant 0 : index
    %221 = vector.load %arg3[%c0_75, %c0_76, %c0_77] : memref<2x8x32xf32, #tpu.memory_space<vmem>>, vector<2x8x32xf32>
    tpu.vector_store %arg3[%c0_75, %c0_76, %c0_77], %220 {strides = array<i32>} : memref<2x8x32xf32, #tpu.memory_space<vmem>>, vector<2x8x32xf32>,
    return
  }
}

</mosaic_0001>

<bundles_post_ra>
// kernel: tpu_custom_call.1
= control target key start
LH: loop header
LB: loop body
LE: loop exit
PB: predicated region body
PF: predicated region fallthrough
CT: control target
= control target key end

     0   :  { %8 = vsyncpa [#allocation4], 0  ;;  %s4363_s0 = inlined_call_operand.hbm [shape: f32[2,8,32], index: 0, kind: input, shape index: {}]   ;;  %s4364_s1 = inlined_call_operand.hbm [shape: f32[32,320], index: 1, kind: input, shape index: {}]   ;;  %s4365_s2 = inlined_call_operand.hbm [shape: f32[9,192], index: 2, kind: input, shape index: {}]   ;;  %s4366_s3 = inlined_call_operand.hbm [shape: f32[2,8,32], index: 3, kind: output, shape index: {}]  }
   0x1   :  { %9 = vsyncpa [#allocation7], 0 }
   0x2   :  { %10 = vsyncpa [#allocation5], 0  ;;  %s3852_s12 = smov [#allocation6]  }
   0x3   :  { %s28_s13 = sshll.u32 %s3852_s12, 4  ;;  %s29_s13 = int_to_ptr.vmem [resolvable:$true] %s28_s13 }
   0x4   :  { %s3774_s14 = scalar_lea.vmem %s29_s13, 1536  ;;  %p3779_p1 = scmp.lt.s32.totalorder %s29_s13, %s29_s13 }
   0x5   :  { %p3775_p0 = scmp.ne.s32.totalorder %s29_s13, %s3774_s14  ;;  %p3780_p2 = scmp.lt.s32.totalorder %s3774_s14, %s3774_s14 }
   0x7   :  { %p3781_p3 = por %p3780_p2, %p3779_p1 }
   0x9   :  { %p3782_p4 = pnand %p3781_p3, %p3775_p0 }
   0xb   :  { %3785 = shalt.err (!%p3782_p4)
}
   0xc   :  { %s3853_s15 = smov 384   ;;  %s3854_s16 = smov 24  }
   0xd   :  { %34 = dma.hbm_to_vmem [thread:$0]  %s4364_s1, 1536, %s29_s13, [#allocation7], %s3853_s15, %s3853_s15, %s3854_s16  }
   0xe   :  { %s3855_s19 = smov [#allocation3]  }
   0xf   :  { %s16_s20 = sshll.u32 %s3855_s19, 4  ;;  %s17_s20 = int_to_ptr.vmem [resolvable:$true] %s16_s20 }
  0x10   :  { %s3794_s21 = scalar_lea.vmem %s17_s20, 256  ;;  %p3799_p6 = scmp.lt.s32.totalorder %s17_s20, %s17_s20 }
  0x11   :  { %p3795_p5 = scmp.ne.s32.totalorder %s17_s20, %s3794_s21  ;;  %p3800_p7 = scmp.lt.s32.totalorder %s3794_s21, %s3794_s21 }
  0x13   :  { %p3801_p8 = por %p3800_p7, %p3799_p6 }
  0x15   :  { %p3802_p9 = pnand %p3801_p8, %p3795_p5 }
  0x17   :  { %3805 = shalt.err (!%p3802_p9)
}
  0x18   :  { %s3856_s22 = smov 128   ;;  %s3857_s23 = smov 8  }
  0x19   :  { %22 = dma.hbm_to_vmem [thread:$0]  %s4363_s0, 256, %s17_s20, [#allocation4], %s3856_s22, %s3856_s22, %s3857_s23  }
  0x1a   :  { %s3858_s1 = smov [#allocation8]  }
  0x1b   :  { %s40_s26 = sshll.u32 %s3858_s1, 4  ;;  %s41_s26 = int_to_ptr.vmem [resolvable:$true] %s40_s26 }
  0x1c   :  { %s3814_s27 = scalar_lea.vmem %s41_s26, 512  ;;  %p3819_p11 = scmp.lt.s32.totalorder %s41_s26, %s41_s26 }
  0x1d   :  { %p3815_p10 = scmp.ne.s32.totalorder %s41_s26, %s3814_s27  ;;  %p3820_p12 = scmp.lt.s32.totalorder %s3814_s27, %s3814_s27 }
  0x1f   :  { %p3821_p13 = por %p3820_p12, %p3819_p11 }
  0x21   :  { %p3822_p0 = pnand %p3821_p13, %p3815_p10 }
  0x23   :  { %3825 = shalt.err (!%p3822_p0)
}
  0x24   :  { %s3859_s28 = smov 256   ;;  %s3860_s29 = smov 16  }
  0x25   :  { %46 = dma.hbm_to_vmem [thread:$0]  %s4365_s2, 512, %s41_s26, [#allocation7], %s3859_s28, %s3859_s28, %s3860_s29  }
  0x26   :  { %3846 = dma.done.wait [#allocation4], 256  }
  0x27   :  { %3847 = vsyncadd [#allocation4], 4294967040 }
  0x28   :  { %3848 = dma.done.wait [#allocation7], 2048  }
  0x29   :  { %3849 = vsyncadd [#allocation7], 4294965248  ;;  %v3861_v0 = vmov 0.0   ;;  %v68_v1 = vld [vmem:[#allocation6 + $0x50] sm:$0xff]  ;;  %v67_v2 = vld [vmem:[#allocation6 + $0x48] sm:$0xff]  ;;  %vm81_vm0 = vcmask 261120   ;;  %v73_v11 = vlaneseq }
  0x2a   :  { %152 = vmatprep.mubr.f32.mxu0 %v3861_v0  ;;  %3476 = vmatprep.subr.mxu1 %v3861_v0  ;;  %v65_v3 = vld [vmem:[#allocation6 + $0x38] sm:$0xff]  ;;  %v64_v4 = vld [vmem:[#allocation6 + $0x30] sm:$0xff]  ;;  %v62_v5 = vld [vmem:[#allocation6 + $0x20] sm:$0xff]  ;;  %vm3862_vm1 = vmmov 0   ;;  %s3863_s0 = smov 96   ;;  %s3864_s2 = smov 64  }
  0x2b   :  { %112 = vmatprep.subr.mxu0 %v68_v1  ;;  %v61_v6 = vld [vmem:[#allocation6 + $0x18] sm:$0xff]  ;;  %v59_v7 = vld [vmem:[#allocation6 + $0x8] sm:$0xff]  ;;  %v58_v8 = vld [vmem:[#allocation6] sm:$0xff]  ;;  %v3916_v12 = vshrl.u32 %v73_v11, 7  ;;  %3478 = vmatprep.mubr.msk.f32.mxu1 %vm3862_vm1, %v3861_v0  ;;  %s3865_s5 = smov 32   ;;  %s3866_s6 = smov 88  }
  0x2c   :  { %113 = vmatpush1.msra.mxu0 %v67_v2  ;;  %v56_v9 = vld [vmem:[#allocation3] sm:$0xff]  ;;  %v57_v10 = vld [vmem:[#allocation3 + $0x8] sm:$0xff]  ;;  %v70_v14 = vld [vmem:[#allocation8] sm:$0xff]  ;;  %vm169_vm2 = vcmask 64512   ;;  %vm349_vm3 = vcmask 1044480   ;;  %vm322_vm4 = vcmask 34816  }
  0x2d   :  { %114 = vmatprep.subr.mxu0 %v65_v3  ;;  %v75_v13 = vsub.s32 0, %v3916_v12  ;;  %v71_v23 = vld [vmem:[#allocation8 + $0x8] sm:$0xff]  ;;  %vm345_vm5 = vcmask 39936   ;;  %vm660_vm6 = vcmask 36864   ;;  %s3867_s7 = smov 120   ;;  %s3868_s8 = smov 56  }
  0x2e   :  { %115 = vmatpush1.msra.mxu0 %v64_v4  ;;  %s3869_s9 = smov 80   ;;  %s3870_s10 = smov 112   ;;  %vm501_vm7 = vcmask 59392   ;;  %vm837_vm8 = vcmask 61440   ;;  %vm1180_vm9 = vcmask 124992   ;;  %vm1523_vm10 = vcmask 127040  }
  0x2f   :  { %116 = vmatprep.subr.mxu0 %v62_v5  ;;  %v76_v15 = vrot.slane %v70_v14, %v75_v13  ;;  %v80_v24 = vrot.slane %v71_v23, %v75_v13  ;;  %s3871_s11 = smov 48   ;;  %s3872_s12 = smov 72   ;;  %vm2209_vm11 = vcmask 192640   ;;  %vm1866_vm12 = vcmask 190592  }
  0x30   :  { %117 = vmatpush1.msra.mxu0 %v61_v6  ;;  %s3873_s13 = smov 104   ;;  %s3874_s14 = smov 40   ;;  %vm2552_vm13 = vcmask 256192   ;;  %vm2895_vm14 = vcmask 258240   ;;  %vm2999_vm15 = vcmp.lt.s32.totalorder %v3916_v12, 3 }
  0x31   :  { %118 = vmatprep.subr.mxu0 %v59_v7  ;;  %s3875_s15 = smov [#allocation9]  }
  0x32   :  { %119 = vmatpush1.msra.mxu0 %v58_v8 }
  0x33   :  { %3321 = vmatmul.mubr.msk.f32.vlgmr.msra.gmra.mxu0 %vm81_vm0, %v56_v9  ;;  %3491 = vmatprep.subr.mxu0 %v3861_v0 }
  0x34   :  { %158 = vmatprep.mubr.f32.mxu0 %v3861_v0 }
  0x37   :  { %3322 = vmatmul.mubr.msk.f32.gmra.mxu0 %vm81_vm0, %v57_v10 }
  0x38   :  { %3493 = vmatprep.mubr.msk.f32.mxu0 %vm3862_vm1, %v3861_v0 }
  0xf3   :  { %v154_v16 = vpop.f32.mrf.mxu0 }
  0xf4   :  { %v3923_v17 = vadd.f32 %v154_v16, %v76_v15 }
  0xf5   :  { %v156_v18 = vpop.f32.mrf.mxu0 }
  0xf6   :  { %v3926_v19 = vrot.slane %v3923_v17, 3  ;;  %v157_v25 = vadd.f32 %v156_v18, %v80_v24 }
  0xf7   :  { %v160_v20 = vpop.f32.mrf.mxu0 }
  0xf8   :  { %v3928_v21 = vadd.f32 %v160_v20, %v76_v15  ;;  %167 = vrot.lane.b32.xlu0 %v3926_v19, %s3863_s0  ;;  %v3943_v26 = vrot.slane %v157_v25, 3 }
  0xf9   :  { %v162_v36 = vpop.f32.mrf.mxu0 }
  0xfa   :  { %v3933_v22 = vrot.slane %v3928_v21, 3  ;;  %v163_v37 = vadd.f32 %v162_v36, %v80_v24 }
  0xfc   :  { %246 = vrot.lane.b32.xlu0 %v3933_v22, %s3863_s0  ;;  %v3967_v38 = vrot.slane %v163_v37, 3 }
 0x100   :  { %343 = vrot.lane.b32.xlu0 %v3926_v19, %s3864_s2 }
 0x104   :  { %504 = vrot.lane.b32.xlu0 %v3926_v19, %s3865_s5 }
 0x108   :  { %582 = vrot.lane.b32.xlu0 %v3933_v22, %s3865_s5 }
 0x10c   :  { %681 = vrot.lane.b32.xlu0 %v3943_v26, %s3863_s0 }
 0x110   :  { %842 = vrot.lane.b32.xlu0 %v3926_v19, %s3866_s6 }
 0x16a   :  { %v168_v27 = vpop.permute.xlu0 %167 }
 0x16b   :  { %3477 = vmatpush3.xpose.msk.msra.mxu1 %vm169_vm2, %v168_v27 }
 0x16c   :  { %3481 = vmatprep.subr.mxu1 %v3861_v0 }
 0x16e   :  { %3479 = vmatmul.mubr.msk.f32.vlgmr.msra.gmra.mxu1 %vm169_vm2, %v3923_v17  ;;  %v247_v28 = vpop.permute.xlu0 %246 }
 0x16f   :  { %3482 = vmatpush3.xpose.msk.msra.mxu1 %vm169_vm2, %v247_v28  ;;  %3483 = vmatprep.mubr.msk.f32.mxu1 %vm3862_vm1, %v3861_v0 }
 0x170   :  { %3486 = vmatprep.subr.mxu1 %v3861_v0 }
 0x172   :  { %3484 = vmatmul.mubr.msk.f32.vlgmr.msra.gmra.mxu1 %vm169_vm2, %v3928_v21  ;;  %v344_v29 = vpop.permute.xlu0 %343 }
 0x173   :  { %3487 = vmatpush3.msk.msra.mxu1 %vm349_vm3, %v344_v29  ;;  %3488 = vmatprep.mubr.msk.f32.mxu1 %vm3862_vm1, %v3861_v0 }
 0x174   :  { %3496 = vmatprep.subr.mxu1 %v3861_v0 }
 0x176   :  { %v505_v46 = vpop.permute.xlu0 %504 }
 0x17a   :  { %v583_v47 = vpop.permute.xlu0 %582 }
 0x17e   :  { %v682_v50 = vpop.permute.xlu0 %681 }
 0x182   :  { %v843_v62 = vpop.permute.xlu0 %842 }
 0x22e   :  { %v240_v30 = vpop.f32.mrf.mxu1 }
 0x22f   :  { %v323_v31 = vsel %vm322_vm4, %v240_v30, -inf }
 0x230   :  { %324 = vmax.xlane.f32.xlu1 %v323_v31  ;;  %v3480_v32 = vpop.f32.mrf.mxu1 }
 0x232   :  { %v318_v33 = vpop.f32.mrf.mxu1 }
 0x233   :  { %v326_v34 = vsel %vm322_vm4, %v318_v33, -inf }
 0x234   :  { %327 = vmax.xlane.f32.xlu1 %v326_v34  ;;  %v3485_v35 = vpop.f32.mrf.mxu1 }
 0x245   :  { %422 = vrot.lane.b32.xlu1 %v3933_v22, %s3864_s2 }
 0x249   :  { %758 = vrot.lane.b32.xlu1 %v3967_v38, %s3863_s0 }
 0x2b9   :  { %v325_v39 = vpop.xlane.xlu1 %324 }
 0x2ba   :  { %v329_v40 = vsub.f32 %v240_v30, %v325_v39 }
 0x2bc   :  { %v331_v41 = vmul.f32 1.442695, %v329_v40 }
 0x2bd   :  { %v328_v42 = vpop.xlane.xlu1 %327 }
 0x2be   :  { %3693 = vpow2.f32 %v331_v41  ;;  %v330_v43 = vsub.f32 %v318_v33, %v328_v42 }
 0x2c0   :  { %v333_v44 = vmul.f32 1.442695, %v330_v43 }
 0x2c1   :  { %v423_v45 = vpop.permute.xlu1 %422 }
 0x2c2   :  { %3695 = vpow2.f32 %v333_v44  ;;  %3492 = vmatpush3.msk.msra.mxu0 %vm349_vm3, %v423_v45 }
 0x2c3   :  { %3501 = vmatprep.subr.mxu0 %v3861_v0 }
 0x2c5   :  { %v759_v51 = vpop.permute.xlu1 %758 }
 0x2cb   :  { %v3973_v48 = vpop.eup %3693 }
 0x2cc   :  { %3489 = vmatmul.mubr.msk.f32.vlgmr.msra.gmra.mxu1 %vm345_vm5, %v3973_v48 }
 0x2cd   :  { %3497 = vmatpush3.xpose.msk.msra.mxu1 %vm169_vm2, %v3943_v26  ;;  %3498 = vmatprep.mubr.msk.f32.mxu1 %vm3862_vm1, %v3861_v0 }
 0x2ce   :  { %3506 = vmatprep.subr.mxu1 %v3861_v0 }
 0x2cf   :  { %v3982_v49 = vpop.eup %3695 }
 0x2d0   :  { %3494 = vmatmul.mubr.msk.f32.vlgmr.msra.gmra.mxu0 %vm345_vm5, %v3982_v49  ;;  %3499 = vmatmul.mubr.msk.f32.vlgmr.msra.gmra.mxu1 %vm169_vm2, %v505_v46 }
 0x2d1   :  { %3502 = vmatpush3.xpose.msk.msra.mxu0 %vm169_vm2, %v3967_v38  ;;  %3507 = vmatpush3.msk.msra.mxu1 %vm349_vm3, %v682_v50 }
 0x2d2   :  { %3503 = vmatprep.mubr.msk.f32.mxu0 %vm3862_vm1, %v3861_v0  ;;  %3511 = vmatprep.subr.mxu0 %v3861_v0 }
 0x2d3   :  { %3508 = vmatprep.mubr.msk.f32.mxu1 %vm3862_vm1, %v3861_v0  ;;  %3516 = vmatprep.subr.mxu1 %v3861_v0 }
 0x2d4   :  { %3504 = vmatmul.mubr.msk.f32.vlgmr.msra.gmra.mxu0 %vm169_vm2, %v583_v47 }
 0x2d5   :  { %3512 = vmatpush3.msk.msra.mxu0 %vm349_vm3, %v759_v51  ;;  %3513 = vmatprep.mubr.msk.f32.mxu0 %vm3862_vm1, %v3861_v0 }
 0x2d6   :  { %3521 = vmatprep.subr.mxu0 %v3861_v0 }
 0x38c   :  { %v4001_v52 = vpop.f32.mrf.mxu1 }
 0x38e   :  { %v3490_v53 = vpop.f32.mrf.mxu1 }
 0x390   :  { %v4003_v54 = vpop.f32.mrf.mxu0  ;;  %v578_v55 = vpop.f32.mrf.mxu1 }
 0x391   :  { %v661_v56 = vsel %vm660_vm6, %v578_v55, -inf }
 0x392   :  { %v3495_v57 = vpop.f32.mrf.mxu0  ;;  %662 = vmax.xlane.f32.xlu0 %v661_v56  ;;  %v3500_v58 = vpop.f32.mrf.mxu1 }
 0x394   :  { %v656_v59 = vpop.f32.mrf.mxu0 }
 0x395   :  { %v664_v60 = vsel %vm660_vm6, %v656_v59, -inf }
 0x396   :  { %665 = vmax.xlane.f32.xlu1 %v664_v60  ;;  %v3505_v61 = vpop.f32.mrf.mxu0 }
 0x3a7   :  { %840 = vrot.lane.b32.xlu1 %v3923_v17, %s3867_s7 }
 0x3a8   :  { %920 = vrot.lane.b32.xlu0 %v3933_v22, %s3866_s6 }
 0x3ab   :  { %1093 = vrot.lane.b32.xlu1 %v3933_v22, %s3868_s8 }
 0x3ac   :  { %918 = vrot.lane.b32.xlu0 %v3928_v21, %s3867_s7 }
 0x3af   :  { %1185 = vrot.lane.b32.xlu1 %v3943_v26, %s3867_s7 }
 0x3b0   :  { %1016 = vrot.lane.b32.xlu0 %v3926_v19, %s3868_s8 }
 0x41b   :  { %v663_v63 = vpop.xlane.xlu0 %662 }
 0x41c   :  { %v667_v1 = vsub.f32 %v578_v55, %v663_v63 }
 0x41e   :  { %v669_v2 = vmul.f32 1.442695, %v667_v1 }
 0x41f   :  { %v666_v3 = vpop.xlane.xlu1 %665  ;;  %v921_v6 = vpop.permute.xlu0 %920 }
 0x420   :  { %3697 = vpow2.f32 %v669_v2  ;;  %v668_v4 = vsub.f32 %v656_v59, %v666_v3 }
 0x422   :  { %v671_v5 = vmul.f32 1.442695, %v668_v4 }
 0x423   :  { %v919_v7 = vpop.permute.xlu0 %918  ;;  %v841_v9 = vpop.permute.xlu1 %840 }
 0x424   :  { %3699 = vpow2.f32 %v671_v5 }
 0x427   :  { %v1017_v11 = vpop.permute.xlu0 %1016  ;;  %v1094_v13 = vpop.permute.xlu1 %1093 }
 0x42b   :  { %v1186_v29 = vpop.permute.xlu1 %1185 }
 0x42d   :  { %v4017_v8 = vpop.eup %3697 }
 0x42e   :  { %3509 = vmatmul.mubr.msk.f32.vlgmr.msra.gmra.mxu1 %vm345_vm5, %v4017_v8 }
 0x42f   :  { %3517 = vmatpush3.xpose.msk.msra.mxu1 %vm169_vm2, %v843_v62  ;;  %3518 = vmatprep.mubr.msk.f32.mxu1 %vm3862_vm1, %v3861_v0 }
 0x430   :  { %3526 = vmatprep.subr.mxu1 %v3861_v0 }
 0x431   :  { %v4025_v10 = vpop.eup %3699 }
 0x432   :  { %3514 = vmatmul.mubr.msk.f32.vlgmr.msra.gmra.mxu0 %vm345_vm5, %v4025_v10  ;;  %3519 = vmatmul.mubr.msk.f32.vlgmr.msra.gmra.mxu1 %vm169_vm2, %v841_v9 }
 0x433   :  { %3522 = vmatpush3.xpose.msk.msra.mxu0 %vm169_vm2, %v921_v6  ;;  %3527 = vmatpush3.msk.msra.mxu1 %vm349_vm3, %v1017_v11 }
 0x434   :  { %3523 = vmatprep.mubr.msk.f32.mxu0 %vm3862_vm1, %v3861_v0  ;;  %3531 = vmatprep.subr.mxu0 %v3861_v0 }
 0x435   :  { %3528 = vmatprep.mubr.msk.f32.mxu1 %vm3862_vm1, %v3861_v0  ;;  %3536 = vmatprep.subr.mxu1 %v3861_v0 }
 0x436   :  { %3524 = vmatmul.mubr.msk.f32.vlgmr.msra.gmra.mxu0 %vm169_vm2, %v919_v7 }
 0x437   :  { %3532 = vmatpush3.msk.msra.mxu0 %vm349_vm3, %v1094_v13  ;;  %3533 = vmatprep.mubr.msk.f32.mxu0 %vm3862_vm1, %v3861_v0 }
 0x438   :  { %3541 = vmatprep.subr.mxu0 %v3861_v0 }
 0x4ee   :  { %v4043_v14 = vpop.f32.mrf.mxu1 }
 0x4f0   :  { %v3510_v15 = vpop.f32.mrf.mxu1 }
 0x4f2   :  { %v4045_v16 = vpop.f32.mrf.mxu0  ;;  %v914_v18 = vpop.f32.mrf.mxu1 }
 0x4f3   :  { %v996_v20 = vsel %vm322_vm4, %v914_v18, -inf }
 0x4f4   :  { %v3515_v23 = vpop.f32.mrf.mxu0  ;;  %997 = vmax.xlane.f32.xlu1 %v996_v20  ;;  %v3520_v24 = vpop.f32.mrf.mxu1 }
 0x4f6   :  { %v992_v25 = vpop.f32.mrf.mxu0 }
 0x4f7   :  { %v999_v27 = vsel %vm322_vm4, %v992_v25, -inf }
 0x4f8   :  { %1000 = vmax.xlane.f32.xlu0 %v999_v27  ;;  %v3525_v28 = vpop.f32.mrf.mxu0 }
 0x505   :  { %1183 = vrot.lane.b32.xlu1 %v3926_v19, %s3854_s16 }
 0x509   :  { %1436 = vrot.lane.b32.xlu1 %v3967_v38, %s3866_s6 }
 0x50d   :  { %1528 = vrot.lane.b32.xlu1 %v3926_v19, %s3869_s9 }
 0x50e   :  { %1263 = vrot.lane.b32.xlu0 %v3967_v38, %s3867_s7 }
 0x512   :  { %1261 = vrot.lane.b32.xlu0 %v3933_v22, %s3854_s16 }
 0x516   :  { %1359 = vrot.lane.b32.xlu0 %v3943_v26, %s3866_s6 }
 0x57d   :  { %v998_v30 = vpop.xlane.xlu1 %997 }
 0x57e   :  { %v1002_v31 = vsub.f32 %v914_v18, %v998_v30 }
 0x580   :  { %v1004_v32 = vmul.f32 1.442695, %v1002_v31 }
 0x581   :  { %v1001_v33 = vpop.xlane.xlu0 %1000  ;;  %v1184_v40 = vpop.permute.xlu1 %1183 }
 0x582   :  { %3701 = vpow2.f32 %v1004_v32  ;;  %v1003_v34 = vsub.f32 %v992_v25, %v1001_v33 }
 0x584   :  { %v1006_v35 = vmul.f32 1.442695, %v1003_v34 }
 0x585   :  { %v1264_v36 = vpop.permute.xlu0 %1263  ;;  %v1437_v43 = vpop.permute.xlu1 %1436 }
 0x586   :  { %3703 = vpow2.f32 %v1006_v35 }
 0x589   :  { %v1262_v37 = vpop.permute.xlu0 %1261  ;;  %v1529_v58 = vpop.permute.xlu1 %1528 }
 0x58d   :  { %v1360_v42 = vpop.permute.xlu0 %1359 }
 0x58f   :  { %v4061_v39 = vpop.eup %3701 }
 0x590   :  { %3529 = vmatmul.mubr.msk.f32.vlgmr.msra.gmra.mxu1 %vm345_vm5, %v4061_v39 }
 0x591   :  { %3537 = vmatpush3.xpose.msk.msra.mxu1 %vm169_vm2, %v1186_v29  ;;  %3538 = vmatprep.mubr.msk.f32.mxu1 %vm3862_vm1, %v3861_v0 }
 0x592   :  { %3546 = vmatprep.subr.mxu1 %v3861_v0 }
 0x593   :  { %v4069_v41 = vpop.eup %3703 }
 0x594   :  { %3534 = vmatmul.mubr.msk.f32.vlgmr.msra.gmra.mxu0 %vm345_vm5, %v4069_v41  ;;  %3539 = vmatmul.mubr.msk.f32.vlgmr.msra.gmra.mxu1 %vm169_vm2, %v1184_v40 }
 0x595   :  { %3542 = vmatpush3.xpose.msk.msra.mxu0 %vm169_vm2, %v1264_v36  ;;  %3547 = vmatpush3.msk.msra.mxu1 %vm349_vm3, %v1360_v42 }
 0x596   :  { %3543 = vmatprep.mubr.msk.f32.mxu0 %vm3862_vm1, %v3861_v0  ;;  %3551 = vmatprep.subr.mxu0 %v3861_v0 }
 0x597   :  { %3548 = vmatprep.mubr.msk.f32.mxu1 %vm3862_vm1, %v3861_v0  ;;  %3556 = vmatprep.subr.mxu1 %v3861_v0 }
 0x598   :  { %3544 = vmatmul.mubr.msk.f32.vlgmr.msra.gmra.mxu0 %vm169_vm2, %v1262_v37 }
 0x599   :  { %3552 = vmatpush3.msk.msra.mxu0 %vm349_vm3, %v1437_v43  ;;  %3553 = vmatprep.mubr.msk.f32.mxu0 %vm3862_vm1, %v3861_v0 }
 0x59a   :  { %3561 = vmatprep.subr.mxu0 %v3861_v0 }
 0x650   :  { %v4087_v44 = vpop.f32.mrf.mxu1 }
 0x652   :  { %v3530_v45 = vpop.f32.mrf.mxu1 }
 0x654   :  { %v4089_v46 = vpop.f32.mrf.mxu0  ;;  %v1257_v47 = vpop.f32.mrf.mxu1 }
 0x655   :  { %v1339_v50 = vsel %vm660_vm6, %v1257_v47, -inf }
 0x656   :  { %1340 = vmax.xlane.f32.xlu1 %v1339_v50  ;;  %v3535_v51 = vpop.f32.mrf.mxu0  ;;  %v3540_v53 = vpop.f32.mrf.mxu1 }
 0x658   :  { %v1335_v55 = vpop.f32.mrf.mxu0 }
 0x659   :  { %v1342_v56 = vsel %vm660_vm6, %v1335_v55, -inf }
 0x65a   :  { %1343 = vmax.xlane.f32.xlu0 %v1342_v56  ;;  %v3545_v57 = vpop.f32.mrf.mxu0 }
 0x667   :  { %1526 = vrot.lane.b32.xlu1 %v3923_v17, %s3870_s10 }
 0x66b   :  { %1779 = vrot.lane.b32.xlu1 %v3933_v22, %s3871_s11 }
 0x66f   :  { %1871 = vrot.lane.b32.xlu1 %v3943_v26, %s3870_s10 }
 0x670   :  { %1606 = vrot.lane.b32.xlu0 %v3933_v22, %s3869_s9 }
 0x674   :  { %1604 = vrot.lane.b32.xlu0 %v3928_v21, %s3870_s10 }
 0x678   :  { %1702 = vrot.lane.b32.xlu0 %v3926_v19, %s3871_s11 }
 0x6df   :  { %v1341_v59 = vpop.xlane.xlu1 %1340 }
 0x6e0   :  { %v1345_v60 = vsub.f32 %v1257_v47, %v1341_v59 }
 0x6e2   :  { %v1347_v61 = vmul.f32 1.442695, %v1345_v60 }
 0x6e3   :  { %v1344_v62 = vpop.xlane.xlu0 %1343  ;;  %v1527_v5 = vpop.permute.xlu1 %1526 }
 0x6e4   :  { %3705 = vpow2.f32 %v1347_v61  ;;  %v1346_v63 = vsub.f32 %v1335_v55, %v1344_v62 }
 0x6e6   :  { %v1349_v1 = vmul.f32 1.442695, %v1346_v63 }
 0x6e7   :  { %v1607_v2 = vpop.permute.xlu0 %1606  ;;  %v1780_v9 = vpop.permute.xlu1 %1779 }
 0x6e8   :  { %3707 = vpow2.f32 %v1349_v1 }
 0x6eb   :  { %v1605_v3 = vpop.permute.xlu0 %1604  ;;  %v1872_v29 = vpop.permute.xlu1 %1871 }
 0x6ef   :  { %v1703_v7 = vpop.permute.xlu0 %1702 }
 0x6f1   :  { %v4103_v4 = vpop.eup %3705 }
 0x6f2   :  { %3549 = vmatmul.mubr.msk.f32.vlgmr.msra.gmra.mxu1 %vm345_vm5, %v4103_v4 }
 0x6f3   :  { %3557 = vmatpush3.xpose.msk.msra.mxu1 %vm169_vm2, %v1529_v58  ;;  %3558 = vmatprep.mubr.msk.f32.mxu1 %vm3862_vm1, %v3861_v0 }
 0x6f4   :  { %3566 = vmatprep.subr.mxu1 %v3861_v0 }
 0x6f5   :  { %v4111_v6 = vpop.eup %3707 }
 0x6f6   :  { %3554 = vmatmul.mubr.msk.f32.vlgmr.msra.gmra.mxu0 %vm345_vm5, %v4111_v6  ;;  %3559 = vmatmul.mubr.msk.f32.vlgmr.msra.gmra.mxu1 %vm169_vm2, %v1527_v5 }
 0x6f7   :  { %3562 = vmatpush3.xpose.msk.msra.mxu0 %vm169_vm2, %v1607_v2  ;;  %3567 = vmatpush3.msk.msra.mxu1 %vm349_vm3, %v1703_v7 }
 0x6f8   :  { %3563 = vmatprep.mubr.msk.f32.mxu0 %vm3862_vm1, %v3861_v0  ;;  %3571 = vmatprep.subr.mxu0 %v3861_v0 }
 0x6f9   :  { %3568 = vmatprep.mubr.msk.f32.mxu1 %vm3862_vm1, %v3861_v0  ;;  %3576 = vmatprep.subr.mxu1 %v3861_v0 }
 0x6fa   :  { %3564 = vmatmul.mubr.msk.f32.vlgmr.msra.gmra.mxu0 %vm169_vm2, %v1605_v3 }
 0x6fb   :  { %3572 = vmatpush3.msk.msra.mxu0 %vm349_vm3, %v1780_v9  ;;  %3573 = vmatprep.mubr.msk.f32.mxu0 %vm3862_vm1, %v3861_v0 }
 0x6fc   :  { %3581 = vmatprep.subr.mxu0 %v3861_v0 }
 0x7b2   :  { %v4129_v11 = vpop.f32.mrf.mxu1 }
 0x7b4   :  { %v3550_v13 = vpop.f32.mrf.mxu1 }
 0x7b6   :  { %v4131_v15 = vpop.f32.mrf.mxu0  ;;  %v1600_v18 = vpop.f32.mrf.mxu1 }
 0x7b7   :  { %v1682_v20 = vsel %vm322_vm4, %v1600_v18, -inf }
 0x7b8   :  { %1683 = vmax.xlane.f32.xlu1 %v1682_v20  ;;  %v3555_v23 = vpop.f32.mrf.mxu0  ;;  %v3560_v24 = vpop.f32.mrf.mxu1 }
 0x7ba   :  { %v1678_v25 = vpop.f32.mrf.mxu0 }
 0x7bb   :  { %v1685_v27 = vsel %vm322_vm4, %v1678_v25, -inf }
 0x7bc   :  { %1686 = vmax.xlane.f32.xlu0 %v1685_v27  ;;  %v3565_v28 = vpop.f32.mrf.mxu0 }
 0x7c9   :  { %1869 = vrot.lane.b32.xlu1 %v3926_v19, %s3860_s29 }
 0x7cd   :  { %2122 = vrot.lane.b32.xlu1 %v3967_v38, %s3869_s9 }
 0x7d1   :  { %2214 = vrot.lane.b32.xlu1 %v3926_v19, %s3872_s12 }
 0x7d2   :  { %1949 = vrot.lane.b32.xlu0 %v3967_v38, %s3870_s10 }
 0x7d6   :  { %1947 = vrot.lane.b32.xlu0 %v3933_v22, %s3860_s29 }
 0x7da   :  { %2045 = vrot.lane.b32.xlu0 %v3943_v26, %s3869_s9 }
 0x841   :  { %v1684_v30 = vpop.xlane.xlu1 %1683 }
 0x842   :  { %v1688_v31 = vsub.f32 %v1600_v18, %v1684_v30 }
 0x844   :  { %v1690_v32 = vmul.f32 1.442695, %v1688_v31 }
 0x845   :  { %v1687_v33 = vpop.xlane.xlu0 %1686  ;;  %v1870_v42 = vpop.permute.xlu1 %1869 }
 0x846   :  { %3709 = vpow2.f32 %v1690_v32  ;;  %v1689_v34 = vsub.f32 %v1678_v25, %v1687_v33 }
 0x848   :  { %v1692_v35 = vmul.f32 1.442695, %v1689_v34 }
 0x849   :  { %v1950_v36 = vpop.permute.xlu0 %1949  ;;  %v2123_v47 = vpop.permute.xlu1 %2122 }
 0x84a   :  { %3711 = vpow2.f32 %v1692_v35 }
 0x84d   :  { %v1948_v37 = vpop.permute.xlu0 %1947  ;;  %v2215_v62 = vpop.permute.xlu1 %2214 }
 0x851   :  { %v2046_v45 = vpop.permute.xlu0 %2045 }
 0x853   :  { %v4147_v40 = vpop.eup %3709 }
 0x854   :  { %3569 = vmatmul.mubr.msk.f32.vlgmr.msra.gmra.mxu1 %vm345_vm5, %v4147_v40 }
 0x855   :  { %3577 = vmatpush3.xpose.msk.msra.mxu1 %vm169_vm2, %v1872_v29  ;;  %3578 = vmatprep.mubr.msk.f32.mxu1 %vm3862_vm1, %v3861_v0 }
 0x856   :  { %3586 = vmatprep.subr.mxu1 %v3861_v0 }
 0x857   :  { %v4155_v43 = vpop.eup %3711 }
 0x858   :  { %3574 = vmatmul.mubr.msk.f32.vlgmr.msra.gmra.mxu0 %vm345_vm5, %v4155_v43  ;;  %3579 = vmatmul.mubr.msk.f32.vlgmr.msra.gmra.mxu1 %vm169_vm2, %v1870_v42 }
 0x859   :  { %3582 = vmatpush3.xpose.msk.msra.mxu0 %vm169_vm2, %v1950_v36  ;;  %3587 = vmatpush3.msk.msra.mxu1 %vm349_vm3, %v2046_v45 }
 0x85a   :  { %3583 = vmatprep.mubr.msk.f32.mxu0 %vm3862_vm1, %v3861_v0  ;;  %3591 = vmatprep.subr.mxu0 %v3861_v0 }
 0x85b   :  { %3588 = vmatprep.mubr.msk.f32.mxu1 %vm3862_vm1, %v3861_v0  ;;  %3596 = vmatprep.subr.mxu1 %v3861_v0 }
 0x85c   :  { %3584 = vmatmul.mubr.msk.f32.vlgmr.msra.gmra.mxu0 %vm169_vm2, %v1948_v37 }
 0x85d   :  { %3592 = vmatpush3.msk.msra.mxu0 %vm349_vm3, %v2123_v47  ;;  %3593 = vmatprep.mubr.msk.f32.mxu0 %vm3862_vm1, %v3861_v0 }
 0x85e   :  { %3601 = vmatprep.subr.mxu0 %v3861_v0 }
 0x914   :  { %v4173_v50 = vpop.f32.mrf.mxu1 }
 0x916   :  { %v3570_v51 = vpop.f32.mrf.mxu1 }
 0x918   :  { %v4175_v53 = vpop.f32.mrf.mxu0  ;;  %v1943_v55 = vpop.f32.mrf.mxu1 }
 0x919   :  { %v2025_v56 = vsel %vm660_vm6, %v1943_v55, -inf }
 0x91a   :  { %2026 = vmax.xlane.f32.xlu1 %v2025_v56  ;;  %v3575_v57 = vpop.f32.mrf.mxu0  ;;  %v3580_v58 = vpop.f32.mrf.mxu1 }
 0x91c   :  { %v2021_v59 = vpop.f32.mrf.mxu0 }
 0x91d   :  { %v2028_v60 = vsel %vm660_vm6, %v2021_v59, -inf }
 0x91e   :  { %2029 = vmax.xlane.f32.xlu0 %v2028_v60  ;;  %v3585_v61 = vpop.f32.mrf.mxu0 }
 0x92b   :  { %2212 = vrot.lane.b32.xlu1 %v3923_v17, %s3873_s13 }
 0x92f   :  { %2465 = vrot.lane.b32.xlu1 %v3933_v22, %s3874_s14 }
 0x933   :  { %2557 = vrot.lane.b32.xlu1 %v3943_v26, %s3873_s13 }
 0x934   :  { %2292 = vrot.lane.b32.xlu0 %v3933_v22, %s3872_s12 }
 0x938   :  { %2290 = vrot.lane.b32.xlu0 %v3928_v21, %s3873_s13 }
 0x93c   :  { %2388 = vrot.lane.b32.xlu0 %v3926_v19, %s3874_s14 }
 0x9a3   :  { %v2027_v63 = vpop.xlane.xlu1 %2026 }
 0x9a4   :  { %v2031_v1 = vsub.f32 %v1943_v55, %v2027_v63 }
 0x9a6   :  { %v2033_v2 = vmul.f32 1.442695, %v2031_v1 }
 0x9a7   :  { %v2030_v3 = vpop.xlane.xlu0 %2029  ;;  %v2213_v21 = vpop.permute.xlu1 %2212 }
 0x9a8   :  { %3713 = vpow2.f32 %v2033_v2  ;;  %v2032_v17 = vsub.f32 %v2021_v59, %v2030_v3 }
 0x9aa   :  { %v2035_v5 = vmul.f32 1.442695, %v2032_v17 }
 0x9ab   :  { %v2293_v7 = vpop.permute.xlu0 %2292  ;;  %v2466_v23 = vpop.permute.xlu1 %2465 }
 0x9ac   :  { %3715 = vpow2.f32 %v2035_v5  ;;  %v1354_v5 = vsel %vm660_vm6, %v4111_v6, 0.0 }
 0x9af   :  { %v2291_v9 = vpop.permute.xlu0 %2290  ;;  %v2558_v35 = vpop.permute.xlu1 %2557 }
 0x9b3   :  { %v2389_v20 = vpop.permute.xlu0 %2388 }
 0x9b5   :  { %v4189_v13 = vpop.eup %3713 }
 0x9b6   :  { %3589 = vmatmul.mubr.msk.f32.vlgmr.msra.gmra.mxu1 %vm345_vm5, %v4189_v13 }
 0x9b7   :  { %3597 = vmatpush3.xpose.msk.msra.mxu1 %vm169_vm2, %v2215_v62  ;;  %3598 = vmatprep.mubr.msk.f32.mxu1 %vm3862_vm1, %v3861_v0 }
 0x9b8   :  { %3606 = vmatprep.subr.mxu1 %v3861_v0 }
 0x9b9   :  { %v4197_v18 = vpop.eup %3715 }
 0x9ba   :  { %3594 = vmatmul.mubr.msk.f32.vlgmr.msra.gmra.mxu0 %vm345_vm5, %v4197_v18  ;;  %3599 = vmatmul.mubr.msk.f32.vlgmr.msra.gmra.mxu1 %vm169_vm2, %v2213_v21  ;;  %v338_v21 = vsel %vm322_vm4, %v3982_v49, 0.0 }
 0x9bb   :  { %3602 = vmatpush3.xpose.msk.msra.mxu0 %vm169_vm2, %v2293_v7  ;;  %3607 = vmatpush3.msk.msra.mxu1 %vm349_vm3, %v2389_v20  ;;  %v1351_v7 = vsel %vm660_vm6, %v4103_v4, 0.0  ;;  %v1697_v4 = vsel %vm322_vm4, %v4155_v43, 0.0 }
 0x9bc   :  { %3603 = vmatprep.mubr.msk.f32.mxu0 %vm3862_vm1, %v3861_v0  ;;  %3611 = vmatprep.subr.mxu0 %v3861_v0 }
 0x9bd   :  { %3608 = vmatprep.mubr.msk.f32.mxu1 %vm3862_vm1, %v3861_v0  ;;  %3616 = vmatprep.subr.mxu1 %v3861_v0 }
 0x9be   :  { %3604 = vmatmul.mubr.msk.f32.vlgmr.msra.gmra.mxu0 %vm169_vm2, %v2291_v9  ;;  %v2037_v9 = vsel %vm660_vm6, %v4189_v13, 0.0 }
 0x9bf   :  { %3612 = vmatpush3.msk.msra.mxu0 %vm349_vm3, %v2466_v23  ;;  %3613 = vmatprep.mubr.msk.f32.mxu0 %vm3862_vm1, %v3861_v0 }
 0x9c0   :  { %3621 = vmatprep.subr.mxu0 %v3861_v0 }
 0xa76   :  { %v4215_v24 = vpop.f32.mrf.mxu1 }
 0xa78   :  { %v3590_v25 = vpop.f32.mrf.mxu1 }
 0xa7a   :  { %v4217_v27 = vpop.f32.mrf.mxu0  ;;  %v2286_v28 = vpop.f32.mrf.mxu1 }
 0xa7b   :  { %v2368_v29 = vsel %vm322_vm4, %v2286_v28, -inf }
 0xa7c   :  { %2369 = vmax.xlane.f32.xlu1 %v2368_v29  ;;  %v3595_v30 = vpop.f32.mrf.mxu0  ;;  %v3600_v31 = vpop.f32.mrf.mxu1 }
 0xa7e   :  { %v2364_v32 = vpop.f32.mrf.mxu0 }
 0xa7f   :  { %v2371_v33 = vsel %vm322_vm4, %v2364_v32, -inf }
 0xa80   :  { %2372 = vmax.xlane.f32.xlu0 %v2371_v33  ;;  %v3605_v34 = vpop.f32.mrf.mxu0  ;;  %v676_v33 = vsel %vm660_vm6, %v4025_v10, 0.0 }
 0xa8d   :  { %2555 = vrot.lane.b32.xlu1 %v3926_v19, %s3857_s23 }
 0xa96   :  { %2635 = vrot.lane.b32.xlu0 %v3967_v38, %s3873_s13 }
 0xa9a   :  { %2633 = vrot.lane.b32.xlu0 %v3933_v22, %s3857_s23 }
 0xb05   :  { %v2370_v36 = vpop.xlane.xlu1 %2369 }
 0xb06   :  { %v2374_v37 = vsub.f32 %v2286_v28, %v2370_v36 }
 0xb08   :  { %v2376_v42 = vmul.f32 1.442695, %v2374_v37 }
 0xb09   :  { %v2373_v45 = vpop.xlane.xlu0 %2372  ;;  %v2556_v22 = vpop.permute.xlu1 %2555 }
 0xb0a   :  { %3717 = vpow2.f32 %v2376_v42  ;;  %v2375_v47 = vsub.f32 %v2364_v32, %v2373_v45  ;;  %v673_v32 = vsel %vm660_vm6, %v4017_v8, 0.0 }
 0xb0c   :  { %v2378_v51 = vmul.f32 1.442695, %v2375_v47 }
 0xb0d   :  { %v2636_v56 = vpop.permute.xlu0 %2635 }
 0xb0e   :  { %3719 = vpow2.f32 %v2378_v51 }
 0xb11   :  { %v2634_v57 = vpop.permute.xlu0 %2633 }
 0xb17   :  { %v3718_v55 = vpop.eup %3717 }
 0xb18   :  { %3609 = vmatmul.mubr.msk.f32.vlgmr.msra.gmra.mxu1 %vm345_vm5, %v3718_v55  ;;  %v2380_v6 = vsel %vm322_vm4, %v3718_v55, 0.0 }
 0xb19   :  { %3617 = vmatpush3.xpose.msk.msra.mxu1 %vm169_vm2, %v2558_v35  ;;  %3618 = vmatprep.mubr.msk.f32.mxu1 %vm3862_vm1, %v3861_v0 }
 0xb1a   :  { %3626 = vmatprep.subr.mxu1 %v3861_v0 }
 0xb1b   :  { %v3720_v19 = vpop.eup %3719 }
 0xb1c   :  { %3614 = vmatmul.mubr.msk.f32.vlgmr.msra.gmra.mxu0 %vm345_vm5, %v3720_v19  ;;  %3619 = vmatmul.mubr.msk.f32.vlgmr.msra.gmra.mxu1 %vm169_vm2, %v2556_v22  ;;  %v2383_v13 = vsel %vm322_vm4, %v3720_v19, 0.0 }
 0xb1d   :  { %3622 = vmatpush3.xpose.msk.msra.mxu0 %vm169_vm2, %v2636_v56  ;;  %3623 = vmatprep.mubr.msk.f32.mxu0 %vm3862_vm1, %v3861_v0 }
 0xb1e   :  { %3631 = vmatprep.subr.mxu0 %v3861_v0  ;;  %3628 = vmatprep.mubr.msk.f32.mxu1 %vm3862_vm1, %v3861_v0 }
 0xb20   :  { %3624 = vmatmul.mubr.msk.f32.vlgmr.msra.gmra.mxu0 %vm169_vm2, %v2634_v57 }
 0xb21   :  { %3633 = vmatprep.mubr.msk.f32.mxu0 %vm3862_vm1, %v3861_v0  ;;  %v1008_v0 = vsel %vm322_vm4, %v4061_v39, 0.0  ;;  %v1694_v39 = vsel %vm322_vm4, %v4147_v40, 0.0 }
 0xbd8   :  { %v4243_v58 = vpop.f32.mrf.mxu1 }
 0xbda   :  { %v3610_v59 = vpop.f32.mrf.mxu1 }
 0xbdc   :  { %v4245_v60 = vpop.f32.mrf.mxu0  ;;  %v2629_v61 = vpop.f32.mrf.mxu1 }
 0xbdd   :  { %v2711_v62 = vsel %vm660_vm6, %v2629_v61, -inf }
 0xbde   :  { %2712 = vmax.xlane.f32.xlu1 %v2711_v62  ;;  %v3615_v63 = vpop.f32.mrf.mxu0  ;;  %v3620_v1 = vpop.f32.mrf.mxu1 }
 0xbe0   :  { %v2707_v2 = vpop.f32.mrf.mxu0 }
 0xbe1   :  { %v2714_v3 = vsel %vm660_vm6, %v2707_v2, -inf }
 0xbe2   :  { %2715 = vmax.xlane.f32.xlu0 %v2714_v3  ;;  %v3625_v17 = vpop.f32.mrf.mxu0 }
 0xbef   :  { %2808 = vrot.lane.b32.xlu1 %v3967_v38, %s3872_s12  ;;  %v1011_v38 = vsel %vm322_vm4, %v4069_v41, 0.0  ;;  %v335_v41 = vsel %vm322_vm4, %v3973_v48, 0.0 }
 0xbf8   :  { %2731 = vrot.lane.b32.xlu0 %v3943_v26, %s3872_s12  ;;  %v2040_v26 = vsel %vm660_vm6, %v4197_v18, 0.0 }
 0xc13   :  { %1009 = vadd.xlane.f32.xlu1 %v1008_v0 }
 0xc17   :  { %1355 = vadd.xlane.f32.xlu1 %v1354_v5  ;;  %1352 = vadd.xlane.f32.xlu0 %v1351_v7 }
 0xc1b   :  { %2038 = vadd.xlane.f32.xlu1 %v2037_v9  ;;  %1012 = vadd.xlane.f32.xlu0 %v1011_v38  ;;  %v3761_v38 = vld [vmem:[#allocation6 + $0x50] sm:$0xff] }
 0xc1f   :  { %2041 = vadd.xlane.f32.xlu1 %v2040_v26  ;;  %1695 = vadd.xlane.f32.xlu0 %v1694_v39 }
 0xc23   :  { %1698 = vadd.xlane.f32.xlu0 %v1697_v4 }
 0xc27   :  { %2381 = vadd.xlane.f32.xlu0 %v2380_v6 }
 0xc2b   :  { %2384 = vadd.xlane.f32.xlu0 %v2383_v13 }
 0xc2f   :  { %336 = vadd.xlane.f32.xlu0 %v335_v41 }
 0xc33   :  { %339 = vadd.xlane.f32.xlu0 %v338_v21 }
 0xc67   :  { %v2713_v40 = vpop.xlane.xlu1 %2712 }
 0xc68   :  { %v2717_v18 = vsub.f32 %v2629_v61, %v2713_v40 }
 0xc6a   :  { %v2719_v20 = vmul.f32 1.442695, %v2717_v18 }
 0xc6b   :  { %v2809_v23 = vpop.permute.xlu1 %2808  ;;  %v2716_v43 = vpop.xlane.xlu0 %2715 }
 0xc6c   :  { %3721 = vpow2.f32 %v2719_v20  ;;  %v2718_v25 = vsub.f32 %v2707_v2, %v2716_v43  ;;  %3632 = vmatpush3.msk.msra.mxu0 %vm349_vm3, %v2809_v23 }
 0xc6e   :  { %v2721_v28 = vmul.f32 1.442695, %v2718_v25 }
 0xc6f   :  { %v2732_v29 = vpop.permute.xlu0 %2731 }
 0xc70   :  { %3723 = vpow2.f32 %v2721_v28  ;;  %3627 = vmatpush3.msk.msra.mxu1 %vm349_vm3, %v2732_v29 }
 0xc79   :  { %v3722_v48 = vpop.eup %3721 }
 0xc7a   :  { %3629 = vmatmul.mubr.msk.f32.vlgmr.msra.gmra.mxu1 %vm345_vm5, %v3722_v48  ;;  %v2723_v49 = vsel %vm660_vm6, %v3722_v48, 0.0 }
 0xc7b   :  { %2724 = vadd.xlane.f32.xlu1 %v2723_v49 }
 0xc7d   :  { %v3724_v30 = vpop.eup %3723 }
 0xc7e   :  { %3634 = vmatmul.mubr.msk.f32.vlgmr.msra.gmra.mxu0 %vm345_vm5, %v3724_v30  ;;  %v2726_v31 = vsel %vm660_vm6, %v3724_v30, 0.0 }
 0xc7f   :  { %2727 = vadd.xlane.f32.xlu1 %v2726_v31 }
 0xc83   :  { %674 = vadd.xlane.f32.xlu1 %v673_v32 }
 0xc87   :  { %677 = vadd.xlane.f32.xlu1 %v676_v33 }
 0xc9c   :  { %v1010_v34 = vpop.xlane.xlu1 %1009 }
 0xc9d   :  { %3725 = vrcp.f32 %v1010_v34  ;;  %v3008_v34 = vsub.s32 2, %v3916_v12 }
 0xca0   :  { %v1356_v35 = vpop.xlane.xlu1 %1355  ;;  %v1353_v36 = vpop.xlane.xlu0 %1352 }
 0xca1   :  { %3727 = vrcp.f32 %v1356_v35 }
 0xca2   :  { %3729 = vrcp.f32 %v1353_v36 }
 0xca4   :  { %v2039_v37 = vpop.xlane.xlu1 %2038  ;;  %v1013_v42 = vpop.xlane.xlu0 %1012 }
 0xca5   :  { %3731 = vrcp.f32 %v2039_v37  ;;  %v4315_v37 = vld [vmem:[#allocation8] sm:$0xff] }
 0xca6   :  { %3733 = vrcp.f32 %v1013_v42  ;;  %v3009_v42 = vrot.slane %v4315_v37, %v3008_v34 }
 0xca8   :  { %v2042_v45 = vpop.xlane.xlu1 %2041  ;;  %v1696_v47 = vpop.xlane.xlu0 %1695 }
 0xca9   :  { %3735 = vrcp.f32 %v2042_v45  ;;  %v3764_v45 = vld [vmem:[#allocation6 + $0x38] sm:$0xff] }
 0xcaa   :  { %v3726_v51 = vpop.eup %3725  ;;  %3737 = vrcp.f32 %v1696_v47  ;;  %v3765_v47 = vld [vmem:[#allocation6 + $0x8] sm:$0xff] }
 0xcab   :  { %v1170_v8 = vmul.f32 %v3726_v51, %v4087_v44 }
 0xcac   :  { %v1699_v55 = vpop.xlane.xlu0 %1698 }
 0xcad   :  { %3739 = vrcp.f32 %v1699_v55  ;;  %1174 = vrot.lane.b32.xlu0 %v1170_v8, %s3857_s23 }
 0xcae   :  { %v3728_v10 = vpop.eup %3727 }
 0xcaf   :  { %v3730_v56 = vpop.eup %3729  ;;  %v1514_v19 = vmul.f32 %v3728_v10, %v4131_v15 }
 0xcb0   :  { %v2382_v22 = vpop.xlane.xlu0 %2381  ;;  %v1513_v57 = vmul.f32 %v3730_v56, %v4129_v11 }
 0xcb1   :  { %3741 = vrcp.f32 %v2382_v22  ;;  %1519 = vrot.lane.b32.xlu0 %v1514_v19, %s3857_s23 }
 0xcb2   :  { %v3732_v59 = vpop.eup %3731  ;;  %1517 = vrot.lane.b32.xlu1 %v1513_v57, %s3857_s23 }
 0xcb3   :  { %v3734_v61 = vpop.eup %3733  ;;  %v2199_v44 = vmul.f32 %v3732_v59, %v4215_v24 }
 0xcb4   :  { %v2385_v62 = vpop.xlane.xlu0 %2384  ;;  %v1171_v63 = vmul.f32 %v3734_v61, %v4089_v46 }
 0xcb5   :  { %3743 = vrcp.f32 %v2385_v62  ;;  %2203 = vrot.lane.b32.xlu0 %v2199_v44, %s3860_s29 }
 0xcb6   :  { %v3736_v1 = vpop.eup %3735  ;;  %1176 = vrot.lane.b32.xlu1 %v1171_v63, %s3857_s23  ;;  %v69_v63 = vld [vmem:[#allocation6 + $0x58] sm:$0xff] }
 0xcb7   :  { %v3738_v15 = vpop.eup %3737  ;;  %v2200_v11 = vmul.f32 %v3736_v1, %v4217_v27  ;;  %3647 = vmatprep.subr.mxu0 %v69_v63  ;;  %v66_v1 = vld [vmem:[#allocation6 + $0x40] sm:$0xff] }
 0xcb8   :  { %v337_v2 = vpop.xlane.xlu0 %336  ;;  %v1856_v3 = vmul.f32 %v3738_v15, %v4173_v50  ;;  %3648 = vmatpush3.msra.mxu0 %v69_v63  ;;  %v63_v15 = vld [vmem:[#allocation6 + $0x28] sm:$0xff] }
 0xcb9   :  { %3745 = vrcp.f32 %v337_v2  ;;  %2205 = vrot.lane.b32.xlu0 %v2200_v11, %s3860_s29  ;;  %3649 = vmatprep.subr.mxu0 %v66_v1  ;;  %v60_v11 = vld [vmem:[#allocation6 + $0x10] sm:$0xff]  ;;  %v3002_v2 = vsub.s32 1, %v3916_v12 }
 0xcba   :  { %v3740_v17 = vpop.eup %3739  ;;  %1860 = vrot.lane.b32.xlu1 %v1856_v3, %s3860_s29  ;;  %3650 = vmatpush3.msra.mxu0 %v66_v1 }
 0xcbb   :  { %v1857_v46 = vmul.f32 %v3740_v17, %v4175_v53  ;;  %3651 = vmatprep.subr.mxu0 %v63_v15  ;;  %v3003_v3 = vrot.slane %v4315_v37, %v3002_v2 }
 0xcbc   :  { %v340_v24 = vpop.xlane.xlu0 %339  ;;  %3652 = vmatpush3.msra.mxu0 %v63_v15 }
 0xcbd   :  { %3747 = vrcp.f32 %v340_v24  ;;  %3653 = vmatprep.subr.mxu0 %v60_v11 }
 0xcbe   :  { %v3742_v0 = vpop.eup %3741  ;;  %1862 = vrot.lane.b32.xlu1 %v1857_v46, %s3860_s29  ;;  %3654 = vmatpush3.msra.mxu0 %v60_v11 }
 0xcbf   :  { %v2542_v5 = vmul.f32 %v3742_v0, %v4243_v58  ;;  %v3762_v58 = vld [vmem:[#allocation6 + $0x20] sm:$0xff] }
 0xcc2   :  { %v3744_v7 = vpop.eup %3743  ;;  %2546 = vrot.lane.b32.xlu1 %v2542_v5, %s3854_s16 }
 0xcc3   :  { %v2543_v50 = vmul.f32 %v3744_v7, %v4245_v60 }
 0xcc6   :  { %v3746_v27 = vpop.eup %3745  ;;  %2548 = vrot.lane.b32.xlu1 %v2543_v50, %s3854_s16 }
 0xcc7   :  { %v499_v9 = vmul.f32 %v3746_v27, %v4001_v52 }
 0xcc9   :  { %502 = vst.msk [vmem:[#allocation2] sm:$0x7] %vm501_vm7, %v499_v9 }
 0xcca   :  { %v3748_v53 = vpop.eup %3747  ;;  %2910 = vrot.lane.b32.xlu1 %v3761_v38, %s3864_s2 }
 0xccb   :  { %v500_v26 = vmul.f32 %v3748_v53, %v4003_v54 }
 0xccd   :  { %503 = vst.msk [vmem:[#allocation2 + $0x8] sm:$0x7] %vm501_vm7, %v500_v26 }
 0xcce   :  { %2906 = vrot.lane.b32.xlu1 %v3762_v58, %s3864_s2 }
 0xcd2   :  { %3011 = vrot.lane.b32.xlu1 %v3009_v42, %s3865_s5 }
 0xd04   :  { %v2725_v39 = vpop.xlane.xlu1 %2724 }
 0xd08   :  { %v2728_v4 = vpop.xlane.xlu1 %2727 }
 0xd0c   :  { %v675_v60 = vpop.xlane.xlu1 %674 }
 0xd0d   :  { %3749 = vrcp.f32 %v675_v60 }
 0xd10   :  { %v678_v6 = vpop.xlane.xlu1 %677 }
 0xd11   :  { %3751 = vrcp.f32 %v678_v6 }
 0xd12   :  { %3753 = vrcp.f32 %v2725_v39 }
 0xd13   :  { %3755 = vrcp.f32 %v2728_v4 }
 0xd1a   :  { %v3750_v13 = vpop.eup %3749 }
 0xd1b   :  { %v835_v52 = vmul.f32 %v3750_v13, %v4043_v14 }
 0xd1d   :  { %838 = vst.msk [vmem:[#allocation2 + $0x3] sm:$0x1f] %vm837_vm8, %v835_v52 }
 0xd1e   :  { %v3752_v41 = vpop.eup %3751 }
 0xd1f   :  { %v1175_v21 = vpop.permute.xlu0 %1174  ;;  %v836_v54 = vmul.f32 %v3752_v41, %v4045_v16  ;;  %v3754_v29 = vpop.eup %3753 }
 0xd20   :  { %1181 = vst.msk [vmem:[#allocation2] sm:$0x7] %vm1180_vm9, %v1175_v21  ;;  %v3756_v32 = vpop.eup %3755 }
 0xd21   :  { %839 = vst.msk [vmem:[#allocation2 + $0xb] sm:$0x1f] %vm837_vm8, %v836_v54 }
 0xd23   :  { %v1520_v40 = vpop.permute.xlu0 %1519 }
 0xd24   :  { %v1518_v18 = vpop.permute.xlu1 %1517  ;;  %1525 = vst.msk [vmem:[#allocation2 + $0xb] sm:$0x1f] %vm1523_vm10, %v1520_v40 }
 0xd25   :  { %1524 = vst.msk [vmem:[#allocation2 + $0x3] sm:$0x1f] %vm1523_vm10, %v1518_v18 }
 0xd27   :  { %v2204_v20 = vpop.permute.xlu0 %2203 }
 0xd28   :  { %v1177_v23 = vpop.permute.xlu1 %1176  ;;  %2210 = vst.msk [vmem:[#allocation2 + $0x3] sm:$0x1f] %vm2209_vm11, %v2204_v20 }
 0xd29   :  { %1182 = vst.msk [vmem:[#allocation2 + $0x8] sm:$0x7] %vm1180_vm9, %v1177_v23 }
 0xd2b   :  { %v2206_v14 = vpop.permute.xlu0 %2205 }
 0xd2c   :  { %v1861_v43 = vpop.permute.xlu1 %1860  ;;  %2211 = vst.msk [vmem:[#allocation2 + $0xb] sm:$0x1f] %vm2209_vm11, %v2206_v14 }
 0xd2d   :  { %1867 = vst.msk [vmem:[#allocation2] sm:$0x7] %vm1866_vm12, %v1861_v43 }
 0xd30   :  { %v1863_v16 = vpop.permute.xlu1 %1862 }
 0xd31   :  { %1868 = vst.msk [vmem:[#allocation2 + $0x8] sm:$0x7] %vm1866_vm12, %v1863_v16 }
 0xd34   :  { %v2547_v25 = vpop.permute.xlu1 %2546 }
 0xd35   :  { %2553 = vst.msk [vmem:[#allocation2] sm:$0x7] %vm2552_vm13, %v2547_v25 }
 0xd38   :  { %v2549_v28 = vpop.permute.xlu1 %2548 }
 0xd39   :  { %2554 = vst.msk [vmem:[#allocation2 + $0x8] sm:$0x7] %vm2552_vm13, %v2549_v28 }
 0xd3a   :  { %v2804_v48 = vpop.f32.mrf.mxu1 }
 0xd3b   :  { %v2885_v49 = vmul.f32 %v3754_v29, %v2804_v48  ;;  %v3059_v48 = vsub.s32 5, %v3916_v12 }
 0xd3c   :  { %v3630_v30 = vpop.f32.mrf.mxu1  ;;  %v2911_v31 = vpop.permute.xlu1 %2910 }
 0xd3d   :  { %2889 = vrot.lane.b32.xlu0 %v2885_v49, %s3854_s16  ;;  %3636 = vmatprep.subr.mxu1 %v2911_v31  ;;  %v3065_v49 = vsub.s32 6, %v3916_v12  ;;  %v3060_v30 = vrot.slane %v4315_v37, %v3059_v48 }
 0xd3e   :  { %v2881_v33 = vpop.f32.mrf.mxu0  ;;  %3637 = vmatpush3.msra.mxu1 %v2911_v31 }
 0xd3f   :  { %v2886_v35 = vmul.f32 %v3756_v32, %v2881_v33 }
 0xd40   :  { %v3635_v36 = vpop.f32.mrf.mxu0  ;;  %v2907_v56 = vpop.permute.xlu1 %2906 }
 0xd41   :  { %2891 = vrot.lane.b32.xlu0 %v2886_v35, %s3854_s16  ;;  %v3066_v36 = vrot.slane %v4315_v37, %v3065_v49  ;;  %s3308_s16 = sshll.u32 %s3875_s15, 4  ;;  %s3309_s16 = int_to_ptr.vmem [resolvable:$true] %s3308_s16 }
 0xd42   :  { %s3826_s17 = scalar_lea.vmem %s3309_s16, 256  ;;  %p3831_p2 = scmp.lt.s32.totalorder %s3309_s16, %s3309_s16 }
 0xd43   :  { %p3827_p1 = scmp.ne.s32.totalorder %s3309_s16, %s3826_s17  ;;  %p3832_p3 = scmp.lt.s32.totalorder %s3826_s17, %s3826_s17 }
 0xd44   :  { %v3012_v57 = vpop.permute.xlu1 %3011 }
 0xd45   :  { %2908 = vrot.lane.b32.xlu0 %v3764_v45, %s3864_s2  ;;  %p3833_p4 = por %p3832_p3, %p3831_p2 }
 0xd47   :  { %p3834_p5 = pnand %p3833_p4, %p3827_p1 }
 0xd49   :  { %2904 = vrot.lane.b32.xlu0 %v3765_v47, %s3864_s2 }
 0xdaf   :  { %v2890_v51 = vpop.permute.xlu0 %2889 }
 0xdb0   :  { %2896 = vst.msk [vmem:[#allocation2 + $0x3] sm:$0x1f] %vm2895_vm14, %v2890_v51 }
 0xdb3   :  { %v2892_v8 = vpop.permute.xlu0 %2891 }
 0xdb4   :  { %2897 = vst.msk [vmem:[#allocation2 + $0xb] sm:$0x1f] %vm2895_vm14, %v2892_v8 }
 0xdb7   :  { %v2909_v55 = vpop.permute.xlu0 %2908  ;;  %v2898_v10 = vld [vmem:[#allocation2] sm:$0xff] }
 0xdb8   :  { %3638 = vmatprep.subr.mxu1 %v2909_v55  ;;  %3644 = vmatprep.mubr.msk.f32.mxu1 %vm81_vm0, %v2898_v10 }
 0xdb9   :  { %3639 = vmatpush3.msra.mxu1 %v2909_v55 }
 0xdba   :  { %3640 = vmatprep.subr.mxu1 %v2907_v56 }
 0xdbb   :  { %3641 = vmatpush3.msra.mxu1 %v2907_v56  ;;  %v2905_v19 = vpop.permute.xlu0 %2904  ;;  %v2899_v22 = vld [vmem:[#allocation2 + $0x8] sm:$0xff]  ;;  %v3071_v56 = vsub.s32 3, %v3916_v12 }
 0xdbc   :  { %3642 = vmatprep.subr.mxu1 %v2905_v19 }
 0xdbd   :  { %3643 = vmatpush3.msra.mxu1 %v2905_v19  ;;  %v3072_v19 = vrot.slane %v4315_v37, %v3071_v56 }
 0xdbe   :  { %3645 = vmatmul.mubr.msk.f32.vlgmr.msra.gmra.mxu1 %vm81_vm0, %v2899_v22 }
 0xe7e   :  { %v3646_v59 = vpop.f32.mrf.mxu1 }
 0xe7f   :  { %v3015_v61 = vadd.f32 %v3646_v59, %v3012_v57  ;;  %v3005_v17 = vadd.f32 %v3646_v59, %v3003_v3 }
 0xe80   :  { %v2988_v44 = vpop.f32.mrf.mxu1 }
 0xe81   :  { %v3014_v62 = vadd.f32 %v3012_v57, %v2988_v44  ;;  %3020 = vrot.lane.b32.xlu1 %v3015_v61, %s3863_s0  ;;  %v3004_v24 = vadd.f32 %v3003_v3, %v2988_v44 }
 0xe83   :  { %3018 = vrot.lane.b32.xlu0 %v3014_v62, %s3863_s0 }
 0xe85   :  { %3168 = vrot.lane.b32.xlu1 %v66_v1, %s3863_s0 }
 0xe87   :  { %3170 = vrot.lane.b32.xlu0 %v69_v63, %s3863_s0  ;;  %v3158_v63 = vsub.s32 4, %v3916_v12 }
 0xe89   :  { %3164 = vrot.lane.b32.xlu1 %v60_v11, %s3863_s0  ;;  %v3159_v1 = vrot.slane %v4315_v37, %v3158_v63 }
 0xe8b   :  { %3166 = vrot.lane.b32.xlu0 %v63_v15, %s3863_s0 }
 0xef3   :  { %v3021_v46 = vpop.permute.xlu1 %3020 }
 0xef4   :  { %v3025_v0 = vsel %vm2999_vm15, %v3005_v17, %v3021_v46 }
 0xef5   :  { %v3038_v5 = vmul.f32 %v3025_v0, %v3025_v0  ;;  %v3019_v7 = vpop.permute.xlu0 %3018  ;;  %v3027_v27 = vsel %vm81_vm0, %v3025_v0, 0.0 }
 0xef6   :  { %v3024_v50 = vsel %vm2999_vm15, %v3004_v24, %v3019_v7 }
 0xef7   :  { %v3026_v9 = vsel %vm81_vm0, %v3024_v50, 0.0  ;;  %v3037_v53 = vmul.f32 %v3024_v50, %v3024_v50  ;;  %v3040_v26 = vsel %vm81_vm0, %v3038_v5, 0.0  ;;  %v3169_v8 = vpop.permute.xlu1 %3168 }
 0xef8   :  { %v3028_v38 = vadd.f32 %v3027_v27, %v3026_v9 }
 0xef9   :  { %v3039_v58 = vsel %vm81_vm0, %v3037_v53, 0.0  ;;  %v3171_v29 = vpop.permute.xlu0 %3170 }
 0xefa   :  { %v3029_v39 = vrot.slane %v3028_v38, 4  ;;  %v3041_v4 = vadd.f32 %v3040_v26, %v3039_v58  ;;  %3658 = vmatprep.subr.mxu1 %v3171_v29 }
 0xefb   :  { %3659 = vmatpush3.msra.mxu1 %v3171_v29  ;;  %v3165_v10 = vpop.permute.xlu1 %3164 }
 0xefc   :  { %v3030_v60 = vadd.f32 %v3029_v39, %v3028_v38  ;;  %v3042_v6 = vrot.slane %v3041_v4, 4  ;;  %3660 = vmatprep.subr.mxu1 %v3169_v8 }
 0xefd   :  { %3661 = vmatpush3.msra.mxu1 %v3169_v8  ;;  %v3167_v55 = vpop.permute.xlu0 %3166 }
 0xefe   :  { %v3031_v13 = vrot.slane %v3030_v60, 2  ;;  %v3043_v52 = vadd.f32 %v3042_v6, %v3041_v4  ;;  %3662 = vmatprep.subr.mxu1 %v3167_v55 }
 0xeff   :  { %3663 = vmatpush3.msra.mxu1 %v3167_v55 }
 0xf00   :  { %v3032_v41 = vadd.f32 %v3031_v13, %v3030_v60  ;;  %v3044_v21 = vrot.slane %v3043_v52, 2  ;;  %3664 = vmatprep.subr.mxu1 %v3165_v10 }
 0xf01   :  { %3665 = vmatpush3.msra.mxu1 %v3165_v10 }
 0xf02   :  { %v3033_v54 = vrot.slane %v3032_v41, 1  ;;  %v3045_v40 = vadd.f32 %v3044_v21, %v3043_v52 }
 0xf04   :  { %v3034_v18 = vadd.f32 %v3033_v54, %v3032_v41  ;;  %v3046_v20 = vrot.slane %v3045_v40, 1 }
 0xf06   :  { %v3036_v23 = vmul.f32 0.0625, %v3034_v18  ;;  %v3047_v14 = vadd.f32 %v3046_v20, %v3045_v40 }
 0xf08   :  { %v3048_v43 = vmul.f32 0.0625, %v3047_v14  ;;  %v3049_v16 = vmul.f32 %v3036_v23, %v3036_v23  ;;  %v3051_v31 = vsub.f32 %v3024_v50, %v3036_v23  ;;  %v3052_v32 = vsub.f32 %v3025_v0, %v3036_v23 }
 0xf0a   :  { %v3050_v25 = vsub.f32 %v3048_v43, %v3049_v16  ;;  %v3291_v43 = vsub.s32 7, %v3916_v12 }
 0xf0c   :  { %v3053_v28 = vadd.f32 1e-05, %v3050_v25 }
 0xf0e   :  { %3757 = vrsqrt.f32 %v3053_v28  ;;  %v3292_v28 = vrot.slane %v4315_v37, %v3291_v43 }
 0xf1b   :  { %v3758_v33 = vpop.eup %3757 }
 0xf1c   :  { %v3055_v34 = vmul.f32 %v3758_v33, %v3051_v31  ;;  %v3056_v35 = vmul.f32 %v3758_v33, %v3052_v32 }
 0xf1e   :  { %v3061_v42 = vmul.f32 %v3060_v30, %v3055_v34  ;;  %v3062_v45 = vmul.f32 %v3060_v30, %v3056_v35  ;;  %v3393_v30 = vld [vmem:[#allocation8 + $0x10] ss:$0 sm:$0xff] }
 0xf20   :  { %v3067_v47 = vadd.f32 %v3066_v36, %v3061_v42  ;;  %v3068_v51 = vadd.f32 %v3066_v36, %v3062_v45 }
 0xf22   :  { %3655 = vmatprep.mubr.msk.f32.mxu0 %vm81_vm0, %v3067_v47 }
 0xf23   :  { %3656 = vmatmul.mubr.msk.f32.vlgmr.msra.gmra.mxu0 %vm81_vm0, %v3068_v51 }
 0xfe3   :  { %v3657_v22 = vpop.f32.mrf.mxu0 }
 0xfe4   :  { %v3151_v57 = vadd.f32 %v3657_v22, %v3072_v19 }
 0xfe5   :  { %v3145_v59 = vpop.f32.mrf.mxu0 }
 0xfe6   :  { %v3146_v61 = vadd.f32 %v3145_v59, %v3072_v19  ;;  %v3155_v62 = vmax.f32 %v3151_v57, 0.0 }
 0xfe8   :  { %v3154_v44 = vmax.f32 %v3146_v61, 0.0 }
 0xfea   :  { %3666 = vmatprep.mubr.msk.f32.mxu1 %vm81_vm0, %v3154_v44 }
 0xfeb   :  { %3667 = vmatmul.mubr.msk.f32.vlgmr.msra.gmra.mxu1 %vm81_vm0, %v3155_v62 }
0x10ab   :  { %v3668_v15 = vpop.f32.mrf.mxu1 }
0x10ac   :  { %v3254_v11 = vadd.f32 %v3668_v15, %v3159_v1 }
0x10ad   :  { %v3248_v2 = vpop.f32.mrf.mxu1 }
0x10ae   :  { %v3258_v3 = vadd.f32 %v3254_v11, %v3068_v51  ;;  %v3249_v17 = vadd.f32 %v3248_v2, %v3159_v1 }
0x10b0   :  { %v3270_v46 = vmul.f32 %v3258_v3, %v3258_v3  ;;  %v3257_v24 = vadd.f32 %v3249_v17, %v3067_v47  ;;  %v3260_v0 = vsel %vm81_vm0, %v3258_v3, 0.0 }
0x10b2   :  { %v3259_v5 = vsel %vm81_vm0, %v3257_v24, 0.0  ;;  %v3269_v7 = vmul.f32 %v3257_v24, %v3257_v24  ;;  %v3272_v27 = vsel %vm81_vm0, %v3270_v46, 0.0 }
0x10b3   :  { %v3261_v50 = vadd.f32 %v3260_v0, %v3259_v5 }
0x10b4   :  { %v3271_v9 = vsel %vm81_vm0, %v3269_v7, 0.0 }
0x10b5   :  { %v3262_v53 = vrot.slane %v3261_v50, 4  ;;  %v3273_v38 = vadd.f32 %v3272_v27, %v3271_v9 }
0x10b7   :  { %v3263_v26 = vadd.f32 %v3262_v53, %v3261_v50  ;;  %v3274_v58 = vrot.slane %v3273_v38, 4 }
0x10b9   :  { %v3264_v39 = vrot.slane %v3263_v26, 2  ;;  %v3275_v4 = vadd.f32 %v3274_v58, %v3273_v38 }
0x10bb   :  { %v3265_v60 = vadd.f32 %v3264_v39, %v3263_v26  ;;  %v3276_v6 = vrot.slane %v3275_v4, 2 }
0x10bd   :  { %v3266_v13 = vrot.slane %v3265_v60, 1  ;;  %v3277_v52 = vadd.f32 %v3276_v6, %v3275_v4 }
0x10bf   :  { %v3267_v41 = vadd.f32 %v3266_v13, %v3265_v60  ;;  %v3278_v21 = vrot.slane %v3277_v52, 1 }
0x10c1   :  { %v3268_v54 = vmul.f32 0.0625, %v3267_v41  ;;  %v3279_v40 = vadd.f32 %v3278_v21, %v3277_v52 }
0x10c3   :  { %v3280_v18 = vmul.f32 0.0625, %v3279_v40  ;;  %v3281_v20 = vmul.f32 %v3268_v54, %v3268_v54  ;;  %v3283_v16 = vsub.f32 %v3257_v24, %v3268_v54  ;;  %v3284_v25 = vsub.f32 %v3258_v3, %v3268_v54 }
0x10c5   :  { %v3282_v23 = vsub.f32 %v3280_v18, %v3281_v20 }
0x10c7   :  { %v3285_v14 = vadd.f32 1e-05, %v3282_v23 }
0x10c9   :  { %3759 = vrsqrt.f32 %v3285_v14 }
0x10d6   :  { %v3760_v29 = vpop.eup %3759 }
0x10d7   :  { %v3287_v48 = vmul.f32 %v3760_v29, %v3283_v16  ;;  %v3288_v49 = vmul.f32 %v3760_v29, %v3284_v25 }
0x10d9   :  { %v3293_v31 = vmul.f32 %v3292_v28, %v3287_v48  ;;  %v3294_v32 = vmul.f32 %v3292_v28, %v3288_v49 }
0x10db   :  { %v3299_v33 = vadd.f32 %v3393_v30, %v3293_v31  ;;  %v3300_v34 = vadd.f32 %v3393_v30, %v3294_v32 }
0x10dd   :  { %3301 = vst.msk [vmem:[#allocation9] sm:$0xff] %vm81_vm0, %v3299_v33  ;;  %3302 = vst.msk [vmem:[#allocation9 + $0x8] sm:$0xff] %vm81_vm0, %v3300_v34 }
0x10de   :  { %3837 = shalt.err (!%p3834_p5)
}
0x10df   :  { %3314 = dma.vmem_to_hbm [thread:$0]  %s3309_s16, 256, %s4366_s3, [#allocation5], %s3856_s22, %s3856_s22, %s3857_s23  }
0x10e0   :  { %3850 = dma.done.wait [#allocation5], 256  }
0x10e1   :  { %3851 = vsyncadd [#allocation5], 4294967040 }
0x10e2   :  { %3318 = vsyncpa [#allocation4], 1 }
0x10e3   :  { %3319 = vsyncpa [#allocation7], 1 }
0x10e4   :  { %3320 = vsyncpa [#allocation5], 1 }

</bundles_post_ra>
